<compile_context>
chip_gen: v7x
topology: tpu7x:2x2x1
jax: 0.10.0
libtpu: 0.0.40
codegen_flags: <defaults>
</compile_context>

<pallas_src>
import functools

import jax
import jax.numpy as jnp
import numpy as np
from jax import lax
from jax.experimental import pallas as pl
from jax.experimental.pallas import tpu as pltpu


def _lstm_fc_kernel(num_layers, hidden_size,
                    x_ref, w_ih_ref, w_hh_ref, b_ref, wfc_ref, bfc_ref,
                    out_ref, pg_ref, seq_ref):
    """Whole forward pass resident in VMEM (shapes are small)."""
    L = num_layers
    H = hidden_size
    T, B, d_max = x_ref.shape

    h = jnp.zeros((B, H), jnp.float32)
    for layer in range(L):
        # ---- Input projection hoisted out of the recurrence: one batched
        #      matmul over all T steps, bias folded in. -----------------------
        if layer == 0:
            inp2d = x_ref[...].reshape(T * B, d_max)        # zero-padded feats
            w_in = w_ih_ref[layer]                          # (d_max, 4H)
        else:
            inp2d = seq_ref[...].reshape(T * B, H)          # previous layer out
            w_in = w_ih_ref[layer][:H, :]                   # (H, 4H)
        pregates = (
            jnp.dot(inp2d, w_in, preferred_element_type=jnp.float32)
            + b_ref[layer]                                  # (1, 4H) broadcast once
        )                                                   # (T*B, 4H)
        pg_ref[...] = pregates.reshape(T, B, 4 * H)

        w_hh_t = w_hh_ref[layer]                            # (H, 4H)
        write_seq = layer + 1 < L                           # skip for last layer

        def step(t, carry, w_hh_t=w_hh_t, write_seq=write_seq):
            h, c = carry
            gates = pg_ref[t] + jnp.dot(h, w_hh_t,
                                        preferred_element_type=jnp.float32)
            # Two full-width (B, 4H) EUP passes; slice afterwards.
            sig = jax.nn.sigmoid(gates)
            th = jnp.tanh(gates)
            i_g = sig[:, 0 * H:1 * H]
            f_g = sig[:, 1 * H:2 * H]
            g_g = th[:, 2 * H:3 * H]
            o_g = sig[:, 3 * H:4 * H]
            c = f_g * c + i_g * g_g
            h = o_g * jnp.tanh(c)
            if write_seq:
                seq_ref[t] = h
            return h, c

        h, _ = lax.fori_loop(
            0, T, step,
            (jnp.zeros((B, H), jnp.float32), jnp.zeros((B, H), jnp.float32)),
            unroll=True)

    # out[:, -1, :] of the last layer == final h.
    logits = (
        jnp.dot(h, wfc_ref[...], preferred_element_type=jnp.float32)
        + bfc_ref[...]
    )
    out_ref[...] = jax.nn.sigmoid(logits)


def rnn_forward(x, params, *, num_layers, hidden_size, num_classes):
    B, T, input_size = x.shape
    H = hidden_size
    L = num_layers
    d_max = max(input_size, H)

    # Time-major layout; zero-pad features of layer-0 input to d_max so all
    # layers share one stacked (L, d_max, 4H) w_ih buffer.
    x_tm = jnp.transpose(x, (1, 0, 2))                       # (T, B, D_in)
    if input_size < d_max:
        x_tm = jnp.pad(x_tm, ((0, 0), (0, 0), (0, d_max - input_size)))

    w_ih_p = []
    for l in range(L):
        w = params["w_ih_t"][l]                              # (D_l, 4H)
        if w.shape[0] < d_max:
            w = jnp.pad(w, ((0, d_max - w.shape[0]), (0, 0)))
        w_ih_p.append(w)
    w_ih = jnp.stack(w_ih_p, axis=0)                         # (L, d_max, 4H)
    w_hh = jnp.stack(params["w_hh_t"], axis=0)               # (L, H, 4H)
    b = jnp.stack(params["b"], axis=0)                       # (L, 1, 4H)

    kernel = functools.partial(_lstm_fc_kernel, L, H)
    vmem = pl.BlockSpec(memory_space=pltpu.MemorySpace.VMEM)
    return pl.pallas_call(
        kernel,
        out_shape=jax.ShapeDtypeStruct((B, num_classes), jnp.float32),
        in_specs=[vmem] * 6,
        out_specs=vmem,
        scratch_shapes=[
            pltpu.VMEM((T, B, 4 * H), jnp.float32),          # pre-gates
            pltpu.VMEM((T, B, H), jnp.float32),              # inter-layer h_t
        ],
    )(x_tm, w_ih, w_hh, b, params["wfc_t"], params["bfc"])


def init_params(key, input_size, hidden_size, num_layers, num_classes):
    """Deterministic PyTorch-style uniform(-1/sqrt(H), 1/sqrt(H)) init."""
    bound = 1.0 / np.sqrt(hidden_size)
    keys = jax.random.split(key, 4 * num_layers + 2)
    w_ih_t, w_hh_t, b = [], [], []
    k = 0
    for layer in range(num_layers):
        d_in = input_size if layer == 0 else hidden_size
        w_ih = jax.random.uniform(keys[k], (4 * hidden_size, d_in),
                                  jnp.float32, -bound, bound); k += 1
        w_hh = jax.random.uniform(keys[k], (4 * hidden_size, hidden_size),
                                  jnp.float32, -bound, bound); k += 1
        b_ih = jax.random.uniform(keys[k], (4 * hidden_size,),
                                  jnp.float32, -bound, bound); k += 1
        b_hh = jax.random.uniform(keys[k], (4 * hidden_size,),
                                  jnp.float32, -bound, bound); k += 1
        w_ih_t.append(w_ih.T)                     # (d_in, 4H)
        w_hh_t.append(w_hh.T)                     # (H, 4H)
        b.append((b_ih + b_hh)[None, :])          # (1, 4H)
    w_fc = jax.random.uniform(keys[k], (num_classes, hidden_size),
                              jnp.float32, -bound, bound); k += 1
    b_fc = jax.random.uniform(keys[k], (num_classes,),
                              jnp.float32, -bound, bound)
    return {
        "w_ih_t": w_ih_t,
        "w_hh_t": w_hh_t,
        "b": b,
        "wfc_t": w_fc.T,              # (H, C)
        "bfc": b_fc[None, :],         # (1, C)
    }


def rnn_reference(x, params, *, num_layers, hidden_size):
    """Pure-JAX reference for validation (batch-first, PyTorch gate order)."""
    B = x.shape[0]
    H = hidden_size
    seq = x
    h = jnp.zeros((B, H), jnp.float32)
    for layer in range(num_layers):
        h = jnp.zeros((B, H), jnp.float32)
        c = jnp.zeros((B, H), jnp.float32)
        outs = []
        for t in range(seq.shape[1]):
            g = (seq[:, t, :] @ params["w_ih_t"][layer]
                 + h @ params["w_hh_t"][layer] + params["b"][layer])
            i_g = jax.nn.sigmoid(g[:, 0 * H:1 * H])
            f_g = jax.nn.sigmoid(g[:, 1 * H:2 * H])
            g_g = jnp.tanh(g[:, 2 * H:3 * H])
            o_g = jax.nn.sigmoid(g[:, 3 * H:4 * H])
            c = f_g * c + i_g * g_g
            h = o_g * jnp.tanh(c)
            outs.append(h)
        seq = jnp.stack(outs, axis=1)
    return jax.nn.sigmoid(h @ params["wfc_t"] + params["bfc"])


if __name__ == "__main__":
    INPUT_SIZE = 16
    HIDDEN_SIZE = 32
    NUM_LAYERS = 2
    NUM_CLASSES = 8
    BATCH = 8
    SEQ = 8

    root = jax.random.PRNGKey(0)
    kx, kp = jax.random.split(root)
    x = jax.random.normal(kx, (BATCH, SEQ, INPUT_SIZE), jnp.float32)
    params = init_params(kp, INPUT_SIZE, HIDDEN_SIZE, NUM_LAYERS, NUM_CLASSES)

    out = rnn_forward(x, params, num_layers=NUM_LAYERS,
                      hidden_size=HIDDEN_SIZE, num_classes=NUM_CLASSES)
    out = jax.block_until_ready(out)

    ref = rnn_reference(x, params, num_layers=NUM_LAYERS, hidden_size=HIDDEN_SIZE)
    np.testing.assert_allclose(np.asarray(out), np.asarray(ref),
                               rtol=1e-5, atol=1e-5)

    print("KERNEL_OK")
</pallas_src>

<mosaic_0001>
module attributes {stable_mosaic.version = 11 : i64} {
  func.func @_lstm_fc_kernel(%arg0: memref<8x8x32xf32, #tpu.memory_space<vmem>>, %arg1: memref<2x32x128xf32, #tpu.memory_space<vmem>>, %arg2: memref<2x32x128xf32, #tpu.memory_space<vmem>>, %arg3: memref<2x1x128xf32, #tpu.memory_space<vmem>>, %arg4: memref<32x8xf32, #tpu.memory_space<vmem>>, %arg5: memref<1x8xf32, #tpu.memory_space<vmem>>, %arg6: memref<8x8xf32, #tpu.memory_space<vmem>>, %arg7: memref<8x8x128xf32, #tpu.memory_space<vmem>>, %arg8: memref<8x8x32xf32, #tpu.memory_space<vmem>>) attributes {dimension_semantics = [], scalar_prefetch = 0 : i64, scratch_operands = 2 : i64, tpu.core_type = #tpu.core_type<tc>} {
    %c0 = arith.constant 0 : index
    %c0_0 = arith.constant 0 : index
    %c0_1 = arith.constant 0 : index
    %0 = vector.load %arg0[%c0, %c0_0, %c0_1] : memref<8x8x32xf32, #tpu.memory_space<vmem>>, vector<8x8x32xf32>
    %1 = vector.shape_cast %0 : vector<8x8x32xf32> to vector<64x32xf32>
    %c0_2 = arith.constant 0 : index
    %c0_3 = arith.constant 0 : index
    %c0_4 = arith.constant 0 : index
    %2 = vector.load %arg1[%c0_2, %c0_3, %c0_4] : memref<2x32x128xf32, #tpu.memory_space<vmem>>, vector<1x32x128xf32>
    %3 = vector.shape_cast %2 : vector<1x32x128xf32> to vector<32x128xf32>
    %cst = arith.constant dense<0.000000e+00> : vector<64x128xf32>
    %4 = tpu.matmul %1, %3, %cst {dimension_numbers = #tpu.dot_dimension_numbers<[1], [0], [0], [1], [0, 0, 1, 1], [], []>} : vector<64x32xf32>, vector<32x128xf32>, vector<64x128xf32> -> vector<64x128xf32>
    %c0_5 = arith.constant 0 : index
    %c0_6 = arith.constant 0 : index
    %c0_7 = arith.constant 0 : index
    %5 = vector.load %arg3[%c0_5, %c0_6, %c0_7] : memref<2x1x128xf32, #tpu.memory_space<vmem>>, vector<1x1x128xf32>
    %6 = vector.shape_cast %5 : vector<1x1x128xf32> to vector<1x128xf32>
    %7 = vector.broadcast %6 : vector<1x128xf32> to vector<64x128xf32>
    %8 = arith.addf %4, %7 : vector<64x128xf32>
    %9 = vector.shape_cast %8 : vector<64x128xf32> to vector<8x8x128xf32>
    %c0_8 = arith.constant 0 : index
    %c0_9 = arith.constant 0 : index
    %c0_10 = arith.constant 0 : index
    %10 = vector.load %arg7[%c0_8, %c0_9, %c0_10] : memref<8x8x128xf32, #tpu.memory_space<vmem>>, vector<8x8x128xf32>
    tpu.vector_store %arg7[%c0_8, %c0_9, %c0_10], %9 {strides = array<i32>} : memref<8x8x128xf32, #tpu.memory_space<vmem>>, vector<8x8x128xf32>,
    %c0_11 = arith.constant 0 : index
    %c0_12 = arith.constant 0 : index
    %c0_13 = arith.constant 0 : index
    %11 = vector.load %arg2[%c0_11, %c0_12, %c0_13] : memref<2x32x128xf32, #tpu.memory_space<vmem>>, vector<1x32x128xf32>
    %12 = vector.shape_cast %11 : vector<1x32x128xf32> to vector<32x128xf32>
    %cst_14 = arith.constant 0.000000e+00 : f32
    %13 = vector.broadcast %cst_14 : f32 to vector<8x32xf32>
    %cst_15 = arith.constant 0.000000e+00 : f32
    %14 = vector.broadcast %cst_15 : f32 to vector<8x32xf32>
    %c0_i32 = arith.constant 0 : i32
    %15 = arith.index_cast %c0_i32 : i32 to index
    %c0_16 = arith.constant 0 : index
    %c0_17 = arith.constant 0 : index
    %16 = vector.load %arg7[%15, %c0_16, %c0_17] : memref<8x8x128xf32, #tpu.memory_space<vmem>>, vector<1x8x128xf32>
    %17 = vector.shape_cast %16 : vector<1x8x128xf32> to vector<8x128xf32>
    %cst_18 = arith.constant dense<0.000000e+00> : vector<8x128xf32>
    %18 = tpu.matmul %13, %12, %cst_18 {dimension_numbers = #tpu.dot_dimension_numbers<[1], [0], [0], [1], [0, 0, 1, 1], [], []>} : vector<8x32xf32>, vector<32x128xf32>, vector<8x128xf32> -> vector<8x128xf32>
    %19 = arith.addf %17, %18 : vector<8x128xf32>
    %20 = arith.negf %19 : vector<8x128xf32>
    %21 = math.exp %20 : vector<8x128xf32>
    %cst_19 = arith.constant 1.000000e+00 : f32
    %22 = vector.broadcast %cst_19 : f32 to vector<8x128xf32>
    %23 = arith.addf %22, %21 : vector<8x128xf32>
    %24 = arith.divf %22, %23 : vector<8x128xf32>
    %25 = math.tanh %19 : vector<8x128xf32>
    %26 = vector.extract_strided_slice %24 {offsets = [0, 0], sizes = [8, 32], strides = [1, 1]} : vector<8x128xf32> to vector<8x32xf32>
    %27 = vector.extract_strided_slice %24 {offsets = [0, 32], sizes = [8, 32], strides = [1, 1]} : vector<8x128xf32> to vector<8x32xf32>
    %28 = vector.extract_strided_slice %25 {offsets = [0, 64], sizes = [8, 32], strides = [1, 1]} : vector<8x128xf32> to vector<8x32xf32>
    %29 = vector.extract_strided_slice %24 {offsets = [0, 96], sizes = [8, 32], strides = [1, 1]} : vector<8x128xf32> to vector<8x32xf32>
    %30 = arith.mulf %27, %14 : vector<8x32xf32>
    %31 = arith.mulf %26, %28 : vector<8x32xf32>
    %32 = arith.addf %30, %31 : vector<8x32xf32>
    %33 = math.tanh %32 : vector<8x32xf32>
    %34 = arith.mulf %29, %33 : vector<8x32xf32>
    %35 = arith.index_cast %c0_i32 : i32 to index
    %c0_20 = arith.constant 0 : index
    %c0_21 = arith.constant 0 : index
    %36 = vector.load %arg8[%35, %c0_20, %c0_21] : memref<8x8x32xf32, #tpu.memory_space<vmem>>, vector<1x8x32xf32>
    %37 = vector.shape_cast %36 : vector<1x8x32xf32> to vector<8x32xf32>
    %38 = vector.shape_cast %34 : vector<8x32xf32> to vector<1x8x32xf32>
    tpu.vector_store %arg8[%35, %c0_20, %c0_21], %38 {strides = array<i32>} : memref<8x8x32xf32, #tpu.memory_space<vmem>>, vector<1x8x32xf32>,
    %c1_i32 = arith.constant 1 : i32
    %39 = arith.index_cast %c1_i32 : i32 to index
    %c0_22 = arith.constant 0 : index
    %c0_23 = arith.constant 0 : index
    %40 = vector.load %arg7[%39, %c0_22, %c0_23] : memref<8x8x128xf32, #tpu.memory_space<vmem>>, vector<1x8x128xf32>
    %41 = vector.shape_cast %40 : vector<1x8x128xf32> to vector<8x128xf32>
    %cst_24 = arith.constant dense<0.000000e+00> : vector<8x128xf32>
    %42 = tpu.matmul %34, %12, %cst_24 {dimension_numbers = #tpu.dot_dimension_numbers<[1], [0], [0], [1], [0, 0, 1, 1], [], []>} : vector<8x32xf32>, vector<32x128xf32>, vector<8x128xf32> -> vector<8x128xf32>
    %43 = arith.addf %41, %42 : vector<8x128xf32>
    %44 = arith.negf %43 : vector<8x128xf32>
    %45 = math.exp %44 : vector<8x128xf32>
    %cst_25 = arith.constant 1.000000e+00 : f32
    %46 = vector.broadcast %cst_25 : f32 to vector<8x128xf32>
    %47 = arith.addf %46, %45 : vector<8x128xf32>
    %48 = arith.divf %46, %47 : vector<8x128xf32>
    %49 = math.tanh %43 : vector<8x128xf32>
    %50 = vector.extract_strided_slice %48 {offsets = [0, 0], sizes = [8, 32], strides = [1, 1]} : vector<8x128xf32> to vector<8x32xf32>
    %51 = vector.extract_strided_slice %48 {offsets = [0, 32], sizes = [8, 32], strides = [1, 1]} : vector<8x128xf32> to vector<8x32xf32>
    %52 = vector.extract_strided_slice %49 {offsets = [0, 64], sizes = [8, 32], strides = [1, 1]} : vector<8x128xf32> to vector<8x32xf32>
    %53 = vector.extract_strided_slice %48 {offsets = [0, 96], sizes = [8, 32], strides = [1, 1]} : vector<8x128xf32> to vector<8x32xf32>
    %54 = arith.mulf %51, %32 : vector<8x32xf32>
    %55 = arith.mulf %50, %52 : vector<8x32xf32>
    %56 = arith.addf %54, %55 : vector<8x32xf32>
    %57 = math.tanh %56 : vector<8x32xf32>
    %58 = arith.mulf %53, %57 : vector<8x32xf32>
    %59 = arith.index_cast %c1_i32 : i32 to index
    %c0_26 = arith.constant 0 : index
    %c0_27 = arith.constant 0 : index
    %60 = vector.load %arg8[%59, %c0_26, %c0_27] : memref<8x8x32xf32, #tpu.memory_space<vmem>>, vector<1x8x32xf32>
    %61 = vector.shape_cast %60 : vector<1x8x32xf32> to vector<8x32xf32>
    %62 = vector.shape_cast %58 : vector<8x32xf32> to vector<1x8x32xf32>
    tpu.vector_store %arg8[%59, %c0_26, %c0_27], %62 {strides = array<i32>} : memref<8x8x32xf32, #tpu.memory_space<vmem>>, vector<1x8x32xf32>,
    %c2_i32 = arith.constant 2 : i32
    %63 = arith.index_cast %c2_i32 : i32 to index
    %c0_28 = arith.constant 0 : index
    %c0_29 = arith.constant 0 : index
    %64 = vector.load %arg7[%63, %c0_28, %c0_29] : memref<8x8x128xf32, #tpu.memory_space<vmem>>, vector<1x8x128xf32>
    %65 = vector.shape_cast %64 : vector<1x8x128xf32> to vector<8x128xf32>
    %cst_30 = arith.constant dense<0.000000e+00> : vector<8x128xf32>
    %66 = tpu.matmul %58, %12, %cst_30 {dimension_numbers = #tpu.dot_dimension_numbers<[1], [0], [0], [1], [0, 0, 1, 1], [], []>} : vector<8x32xf32>, vector<32x128xf32>, vector<8x128xf32> -> vector<8x128xf32>
    %67 = arith.addf %65, %66 : vector<8x128xf32>
    %68 = arith.negf %67 : vector<8x128xf32>
    %69 = math.exp %68 : vector<8x128xf32>
    %cst_31 = arith.constant 1.000000e+00 : f32
    %70 = vector.broadcast %cst_31 : f32 to vector<8x128xf32>
    %71 = arith.addf %70, %69 : vector<8x128xf32>
    %72 = arith.divf %70, %71 : vector<8x128xf32>
    %73 = math.tanh %67 : vector<8x128xf32>
    %74 = vector.extract_strided_slice %72 {offsets = [0, 0], sizes = [8, 32], strides = [1, 1]} : vector<8x128xf32> to vector<8x32xf32>
    %75 = vector.extract_strided_slice %72 {offsets = [0, 32], sizes = [8, 32], strides = [1, 1]} : vector<8x128xf32> to vector<8x32xf32>
    %76 = vector.extract_strided_slice %73 {offsets = [0, 64], sizes = [8, 32], strides = [1, 1]} : vector<8x128xf32> to vector<8x32xf32>
    %77 = vector.extract_strided_slice %72 {offsets = [0, 96], sizes = [8, 32], strides = [1, 1]} : vector<8x128xf32> to vector<8x32xf32>
    %78 = arith.mulf %75, %56 : vector<8x32xf32>
    %79 = arith.mulf %74, %76 : vector<8x32xf32>
    %80 = arith.addf %78, %79 : vector<8x32xf32>
    %81 = math.tanh %80 : vector<8x32xf32>
    %82 = arith.mulf %77, %81 : vector<8x32xf32>
    %83 = arith.index_cast %c2_i32 : i32 to index
    %c0_32 = arith.constant 0 : index
    %c0_33 = arith.constant 0 : index
    %84 = vector.load %arg8[%83, %c0_32, %c0_33] : memref<8x8x32xf32, #tpu.memory_space<vmem>>, vector<1x8x32xf32>
    %85 = vector.shape_cast %84 : vector<1x8x32xf32> to vector<8x32xf32>
    %86 = vector.shape_cast %82 : vector<8x32xf32> to vector<1x8x32xf32>
    tpu.vector_store %arg8[%83, %c0_32, %c0_33], %86 {strides = array<i32>} : memref<8x8x32xf32, #tpu.memory_space<vmem>>, vector<1x8x32xf32>,
    %c3_i32 = arith.constant 3 : i32
    %87 = arith.index_cast %c3_i32 : i32 to index
    %c0_34 = arith.constant 0 : index
    %c0_35 = arith.constant 0 : index
    %88 = vector.load %arg7[%87, %c0_34, %c0_35] : memref<8x8x128xf32, #tpu.memory_space<vmem>>, vector<1x8x128xf32>
    %89 = vector.shape_cast %88 : vector<1x8x128xf32> to vector<8x128xf32>
    %cst_36 = arith.constant dense<0.000000e+00> : vector<8x128xf32>
    %90 = tpu.matmul %82, %12, %cst_36 {dimension_numbers = #tpu.dot_dimension_numbers<[1], [0], [0], [1], [0, 0, 1, 1], [], []>} : vector<8x32xf32>, vector<32x128xf32>, vector<8x128xf32> -> vector<8x128xf32>
    %91 = arith.addf %89, %90 : vector<8x128xf32>
    %92 = arith.negf %91 : vector<8x128xf32>
    %93 = math.exp %92 : vector<8x128xf32>
    %cst_37 = arith.constant 1.000000e+00 : f32
    %94 = vector.broadcast %cst_37 : f32 to vector<8x128xf32>
    %95 = arith.addf %94, %93 : vector<8x128xf32>
    %96 = arith.divf %94, %95 : vector<8x128xf32>
    %97 = math.tanh %91 : vector<8x128xf32>
    %98 = vector.extract_strided_slice %96 {offsets = [0, 0], sizes = [8, 32], strides = [1, 1]} : vector<8x128xf32> to vector<8x32xf32>
    %99 = vector.extract_strided_slice %96 {offsets = [0, 32], sizes = [8, 32], strides = [1, 1]} : vector<8x128xf32> to vector<8x32xf32>
    %100 = vector.extract_strided_slice %97 {offsets = [0, 64], sizes = [8, 32], strides = [1, 1]} : vector<8x128xf32> to vector<8x32xf32>
    %101 = vector.extract_strided_slice %96 {offsets = [0, 96], sizes = [8, 32], strides = [1, 1]} : vector<8x128xf32> to vector<8x32xf32>
    %102 = arith.mulf %99, %80 : vector<8x32xf32>
    %103 = arith.mulf %98, %100 : vector<8x32xf32>
    %104 = arith.addf %102, %103 : vector<8x32xf32>
    %105 = math.tanh %104 : vector<8x32xf32>
    %106 = arith.mulf %101, %105 : vector<8x32xf32>
    %107 = arith.index_cast %c3_i32 : i32 to index
    %c0_38 = arith.constant 0 : index
    %c0_39 = arith.constant 0 : index
    %108 = vector.load %arg8[%107, %c0_38, %c0_39] : memref<8x8x32xf32, #tpu.memory_space<vmem>>, vector<1x8x32xf32>
    %109 = vector.shape_cast %108 : vector<1x8x32xf32> to vector<8x32xf32>
    %110 = vector.shape_cast %106 : vector<8x32xf32> to vector<1x8x32xf32>
    tpu.vector_store %arg8[%107, %c0_38, %c0_39], %110 {strides = array<i32>} : memref<8x8x32xf32, #tpu.memory_space<vmem>>, vector<1x8x32xf32>,
    %c4_i32 = arith.constant 4 : i32
    %111 = arith.index_cast %c4_i32 : i32 to index
    %c0_40 = arith.constant 0 : index
    %c0_41 = arith.constant 0 : index
    %112 = vector.load %arg7[%111, %c0_40, %c0_41] : memref<8x8x128xf32, #tpu.memory_space<vmem>>, vector<1x8x128xf32>
    %113 = vector.shape_cast %112 : vector<1x8x128xf32> to vector<8x128xf32>
    %cst_42 = arith.constant dense<0.000000e+00> : vector<8x128xf32>
    %114 = tpu.matmul %106, %12, %cst_42 {dimension_numbers = #tpu.dot_dimension_numbers<[1], [0], [0], [1], [0, 0, 1, 1], [], []>} : vector<8x32xf32>, vector<32x128xf32>, vector<8x128xf32> -> vector<8x128xf32>
    %115 = arith.addf %113, %114 : vector<8x128xf32>
    %116 = arith.negf %115 : vector<8x128xf32>
    %117 = math.exp %116 : vector<8x128xf32>
    %cst_43 = arith.constant 1.000000e+00 : f32
    %118 = vector.broadcast %cst_43 : f32 to vector<8x128xf32>
    %119 = arith.addf %118, %117 : vector<8x128xf32>
    %120 = arith.divf %118, %119 : vector<8x128xf32>
    %121 = math.tanh %115 : vector<8x128xf32>
    %122 = vector.extract_strided_slice %120 {offsets = [0, 0], sizes = [8, 32], strides = [1, 1]} : vector<8x128xf32> to vector<8x32xf32>
    %123 = vector.extract_strided_slice %120 {offsets = [0, 32], sizes = [8, 32], strides = [1, 1]} : vector<8x128xf32> to vector<8x32xf32>
    %124 = vector.extract_strided_slice %121 {offsets = [0, 64], sizes = [8, 32], strides = [1, 1]} : vector<8x128xf32> to vector<8x32xf32>
    %125 = vector.extract_strided_slice %120 {offsets = [0, 96], sizes = [8, 32], strides = [1, 1]} : vector<8x128xf32> to vector<8x32xf32>
    %126 = arith.mulf %123, %104 : vector<8x32xf32>
    %127 = arith.mulf %122, %124 : vector<8x32xf32>
    %128 = arith.addf %126, %127 : vector<8x32xf32>
    %129 = math.tanh %128 : vector<8x32xf32>
    %130 = arith.mulf %125, %129 : vector<8x32xf32>
    %131 = arith.index_cast %c4_i32 : i32 to index
    %c0_44 = arith.constant 0 : index
    %c0_45 = arith.constant 0 : index
    %132 = vector.load %arg8[%131, %c0_44, %c0_45] : memref<8x8x32xf32, #tpu.memory_space<vmem>>, vector<1x8x32xf32>
    %133 = vector.shape_cast %132 : vector<1x8x32xf32> to vector<8x32xf32>
    %134 = vector.shape_cast %130 : vector<8x32xf32> to vector<1x8x32xf32>
    tpu.vector_store %arg8[%131, %c0_44, %c0_45], %134 {strides = array<i32>} : memref<8x8x32xf32, #tpu.memory_space<vmem>>, vector<1x8x32xf32>,
    %c5_i32 = arith.constant 5 : i32
    %135 = arith.index_cast %c5_i32 : i32 to index
    %c0_46 = arith.constant 0 : index
    %c0_47 = arith.constant 0 : index
    %136 = vector.load %arg7[%135, %c0_46, %c0_47] : memref<8x8x128xf32, #tpu.memory_space<vmem>>, vector<1x8x128xf32>
    %137 = vector.shape_cast %136 : vector<1x8x128xf32> to vector<8x128xf32>
    %cst_48 = arith.constant dense<0.000000e+00> : vector<8x128xf32>
    %138 = tpu.matmul %130, %12, %cst_48 {dimension_numbers = #tpu.dot_dimension_numbers<[1], [0], [0], [1], [0, 0, 1, 1], [], []>} : vector<8x32xf32>, vector<32x128xf32>, vector<8x128xf32> -> vector<8x128xf32>
    %139 = arith.addf %137, %138 : vector<8x128xf32>
    %140 = arith.negf %139 : vector<8x128xf32>
    %141 = math.exp %140 : vector<8x128xf32>
    %cst_49 = arith.constant 1.000000e+00 : f32
    %142 = vector.broadcast %cst_49 : f32 to vector<8x128xf32>
    %143 = arith.addf %142, %141 : vector<8x128xf32>
    %144 = arith.divf %142, %143 : vector<8x128xf32>
    %145 = math.tanh %139 : vector<8x128xf32>
    %146 = vector.extract_strided_slice %144 {offsets = [0, 0], sizes = [8, 32], strides = [1, 1]} : vector<8x128xf32> to vector<8x32xf32>
    %147 = vector.extract_strided_slice %144 {offsets = [0, 32], sizes = [8, 32], strides = [1, 1]} : vector<8x128xf32> to vector<8x32xf32>
    %148 = vector.extract_strided_slice %145 {offsets = [0, 64], sizes = [8, 32], strides = [1, 1]} : vector<8x128xf32> to vector<8x32xf32>
    %149 = vector.extract_strided_slice %144 {offsets = [0, 96], sizes = [8, 32], strides = [1, 1]} : vector<8x128xf32> to vector<8x32xf32>
    %150 = arith.mulf %147, %128 : vector<8x32xf32>
    %151 = arith.mulf %146, %148 : vector<8x32xf32>
    %152 = arith.addf %150, %151 : vector<8x32xf32>
    %153 = math.tanh %152 : vector<8x32xf32>
    %154 = arith.mulf %149, %153 : vector<8x32xf32>
    %155 = arith.index_cast %c5_i32 : i32 to index
    %c0_50 = arith.constant 0 : index
    %c0_51 = arith.constant 0 : index
    %156 = vector.load %arg8[%155, %c0_50, %c0_51] : memref<8x8x32xf32, #tpu.memory_space<vmem>>, vector<1x8x32xf32>
    %157 = vector.shape_cast %156 : vector<1x8x32xf32> to vector<8x32xf32>
    %158 = vector.shape_cast %154 : vector<8x32xf32> to vector<1x8x32xf32>
    tpu.vector_store %arg8[%155, %c0_50, %c0_51], %158 {strides = array<i32>} : memref<8x8x32xf32, #tpu.memory_space<vmem>>, vector<1x8x32xf32>,
    %c6_i32 = arith.constant 6 : i32
    %159 = arith.index_cast %c6_i32 : i32 to index
    %c0_52 = arith.constant 0 : index
    %c0_53 = arith.constant 0 : index
    %160 = vector.load %arg7[%159, %c0_52, %c0_53] : memref<8x8x128xf32, #tpu.memory_space<vmem>>, vector<1x8x128xf32>
    %161 = vector.shape_cast %160 : vector<1x8x128xf32> to vector<8x128xf32>
    %cst_54 = arith.constant dense<0.000000e+00> : vector<8x128xf32>
    %162 = tpu.matmul %154, %12, %cst_54 {dimension_numbers = #tpu.dot_dimension_numbers<[1], [0], [0], [1], [0, 0, 1, 1], [], []>} : vector<8x32xf32>, vector<32x128xf32>, vector<8x128xf32> -> vector<8x128xf32>
    %163 = arith.addf %161, %162 : vector<8x128xf32>
    %164 = arith.negf %163 : vector<8x128xf32>
    %165 = math.exp %164 : vector<8x128xf32>
    %cst_55 = arith.constant 1.000000e+00 : f32
    %166 = vector.broadcast %cst_55 : f32 to vector<8x128xf32>
    %167 = arith.addf %166, %165 : vector<8x128xf32>
    %168 = arith.divf %166, %167 : vector<8x128xf32>
    %169 = math.tanh %163 : vector<8x128xf32>
    %170 = vector.extract_strided_slice %168 {offsets = [0, 0], sizes = [8, 32], strides = [1, 1]} : vector<8x128xf32> to vector<8x32xf32>
    %171 = vector.extract_strided_slice %168 {offsets = [0, 32], sizes = [8, 32], strides = [1, 1]} : vector<8x128xf32> to vector<8x32xf32>
    %172 = vector.extract_strided_slice %169 {offsets = [0, 64], sizes = [8, 32], strides = [1, 1]} : vector<8x128xf32> to vector<8x32xf32>
    %173 = vector.extract_strided_slice %168 {offsets = [0, 96], sizes = [8, 32], strides = [1, 1]} : vector<8x128xf32> to vector<8x32xf32>
    %174 = arith.mulf %171, %152 : vector<8x32xf32>
    %175 = arith.mulf %170, %172 : vector<8x32xf32>
    %176 = arith.addf %174, %175 : vector<8x32xf32>
    %177 = math.tanh %176 : vector<8x32xf32>
    %178 = arith.mulf %173, %177 : vector<8x32xf32>
    %179 = arith.index_cast %c6_i32 : i32 to index
    %c0_56 = arith.constant 0 : index
    %c0_57 = arith.constant 0 : index
    %180 = vector.load %arg8[%179, %c0_56, %c0_57] : memref<8x8x32xf32, #tpu.memory_space<vmem>>, vector<1x8x32xf32>
    %181 = vector.shape_cast %180 : vector<1x8x32xf32> to vector<8x32xf32>
    %182 = vector.shape_cast %178 : vector<8x32xf32> to vector<1x8x32xf32>
    tpu.vector_store %arg8[%179, %c0_56, %c0_57], %182 {strides = array<i32>} : memref<8x8x32xf32, #tpu.memory_space<vmem>>, vector<1x8x32xf32>,
    %c7_i32 = arith.constant 7 : i32
    %183 = arith.index_cast %c7_i32 : i32 to index
    %c0_58 = arith.constant 0 : index
    %c0_59 = arith.constant 0 : index
    %184 = vector.load %arg7[%183, %c0_58, %c0_59] : memref<8x8x128xf32, #tpu.memory_space<vmem>>, vector<1x8x128xf32>
    %185 = vector.shape_cast %184 : vector<1x8x128xf32> to vector<8x128xf32>
    %cst_60 = arith.constant dense<0.000000e+00> : vector<8x128xf32>
    %186 = tpu.matmul %178, %12, %cst_60 {dimension_numbers = #tpu.dot_dimension_numbers<[1], [0], [0], [1], [0, 0, 1, 1], [], []>} : vector<8x32xf32>, vector<32x128xf32>, vector<8x128xf32> -> vector<8x128xf32>
    %187 = arith.addf %185, %186 : vector<8x128xf32>
    %188 = arith.negf %187 : vector<8x128xf32>
    %189 = math.exp %188 : vector<8x128xf32>
    %cst_61 = arith.constant 1.000000e+00 : f32
    %190 = vector.broadcast %cst_61 : f32 to vector<8x128xf32>
    %191 = arith.addf %190, %189 : vector<8x128xf32>
    %192 = arith.divf %190, %191 : vector<8x128xf32>
    %193 = math.tanh %187 : vector<8x128xf32>
    %194 = vector.extract_strided_slice %192 {offsets = [0, 0], sizes = [8, 32], strides = [1, 1]} : vector<8x128xf32> to vector<8x32xf32>
    %195 = vector.extract_strided_slice %192 {offsets = [0, 32], sizes = [8, 32], strides = [1, 1]} : vector<8x128xf32> to vector<8x32xf32>
    %196 = vector.extract_strided_slice %193 {offsets = [0, 64], sizes = [8, 32], strides = [1, 1]} : vector<8x128xf32> to vector<8x32xf32>
    %197 = vector.extract_strided_slice %192 {offsets = [0, 96], sizes = [8, 32], strides = [1, 1]} : vector<8x128xf32> to vector<8x32xf32>
    %198 = arith.mulf %195, %176 : vector<8x32xf32>
    %199 = arith.mulf %194, %196 : vector<8x32xf32>
    %200 = arith.addf %198, %199 : vector<8x32xf32>
    %201 = math.tanh %200 : vector<8x32xf32>
    %202 = arith.mulf %197, %201 : vector<8x32xf32>
    %203 = arith.index_cast %c7_i32 : i32 to index
    %c0_62 = arith.constant 0 : index
    %c0_63 = arith.constant 0 : index
    %204 = vector.load %arg8[%203, %c0_62, %c0_63] : memref<8x8x32xf32, #tpu.memory_space<vmem>>, vector<1x8x32xf32>
    %205 = vector.shape_cast %204 : vector<1x8x32xf32> to vector<8x32xf32>
    %206 = vector.shape_cast %202 : vector<8x32xf32> to vector<1x8x32xf32>
    tpu.vector_store %arg8[%203, %c0_62, %c0_63], %206 {strides = array<i32>} : memref<8x8x32xf32, #tpu.memory_space<vmem>>, vector<1x8x32xf32>,
    %c8_i32 = arith.constant 8 : i32
    %c0_64 = arith.constant 0 : index
    %c0_65 = arith.constant 0 : index
    %c0_66 = arith.constant 0 : index
    %207 = vector.load %arg8[%c0_64, %c0_65, %c0_66] : memref<8x8x32xf32, #tpu.memory_space<vmem>>, vector<8x8x32xf32>
    %208 = vector.shape_cast %207 : vector<8x8x32xf32> to vector<64x32xf32>
    %c1 = arith.constant 1 : index
    %c0_67 = arith.constant 0 : index
    %c0_68 = arith.constant 0 : index
    %209 = vector.load %arg1[%c1, %c0_67, %c0_68] : memref<2x32x128xf32, #tpu.memory_space<vmem>>, vector<1x32x128xf32>
    %210 = vector.shape_cast %209 : vector<1x32x128xf32> to vector<32x128xf32>
    %cst_69 = arith.constant dense<0.000000e+00> : vector<64x128xf32>
    %211 = tpu.matmul %208, %210, %cst_69 {dimension_numbers = #tpu.dot_dimension_numbers<[1], [0], [0], [1], [0, 0, 1, 1], [], []>} : vector<64x32xf32>, vector<32x128xf32>, vector<64x128xf32> -> vector<64x128xf32>
    %c1_70 = arith.constant 1 : index
    %c0_71 = arith.constant 0 : index
    %c0_72 = arith.constant 0 : index
    %212 = vector.load %arg3[%c1_70, %c0_71, %c0_72] : memref<2x1x128xf32, #tpu.memory_space<vmem>>, vector<1x1x128xf32>
    %213 = vector.shape_cast %212 : vector<1x1x128xf32> to vector<1x128xf32>
    %214 = vector.broadcast %213 : vector<1x128xf32> to vector<64x128xf32>
    %215 = arith.addf %211, %214 : vector<64x128xf32>
    %216 = vector.shape_cast %215 : vector<64x128xf32> to vector<8x8x128xf32>
    %c0_73 = arith.constant 0 : index
    %c0_74 = arith.constant 0 : index
    %c0_75 = arith.constant 0 : index
    %217 = vector.load %arg7[%c0_73, %c0_74, %c0_75] : memref<8x8x128xf32, #tpu.memory_space<vmem>>, vector<8x8x128xf32>
    tpu.vector_store %arg7[%c0_73, %c0_74, %c0_75], %216 {strides = array<i32>} : memref<8x8x128xf32, #tpu.memory_space<vmem>>, vector<8x8x128xf32>,
    %c1_76 = arith.constant 1 : index
    %c0_77 = arith.constant 0 : index
    %c0_78 = arith.constant 0 : index
    %218 = vector.load %arg2[%c1_76, %c0_77, %c0_78] : memref<2x32x128xf32, #tpu.memory_space<vmem>>, vector<1x32x128xf32>
    %219 = vector.shape_cast %218 : vector<1x32x128xf32> to vector<32x128xf32>
    %cst_79 = arith.constant 0.000000e+00 : f32
    %220 = vector.broadcast %cst_79 : f32 to vector<8x32xf32>
    %cst_80 = arith.constant 0.000000e+00 : f32
    %221 = vector.broadcast %cst_80 : f32 to vector<8x32xf32>
    %c0_i32_81 = arith.constant 0 : i32
    %222 = arith.index_cast %c0_i32_81 : i32 to index
    %c0_82 = arith.constant 0 : index
    %c0_83 = arith.constant 0 : index
    %223 = vector.load %arg7[%222, %c0_82, %c0_83] : memref<8x8x128xf32, #tpu.memory_space<vmem>>, vector<1x8x128xf32>
    %224 = vector.shape_cast %223 : vector<1x8x128xf32> to vector<8x128xf32>
    %cst_84 = arith.constant dense<0.000000e+00> : vector<8x128xf32>
    %225 = tpu.matmul %220, %219, %cst_84 {dimension_numbers = #tpu.dot_dimension_numbers<[1], [0], [0], [1], [0, 0, 1, 1], [], []>} : vector<8x32xf32>, vector<32x128xf32>, vector<8x128xf32> -> vector<8x128xf32>
    %226 = arith.addf %224, %225 : vector<8x128xf32>
    %227 = arith.negf %226 : vector<8x128xf32>
    %228 = math.exp %227 : vector<8x128xf32>
    %cst_85 = arith.constant 1.000000e+00 : f32
    %229 = vector.broadcast %cst_85 : f32 to vector<8x128xf32>
    %230 = arith.addf %229, %228 : vector<8x128xf32>
    %231 = arith.divf %229, %230 : vector<8x128xf32>
    %232 = math.tanh %226 : vector<8x128xf32>
    %233 = vector.extract_strided_slice %231 {offsets = [0, 0], sizes = [8, 32], strides = [1, 1]} : vector<8x128xf32> to vector<8x32xf32>
    %234 = vector.extract_strided_slice %231 {offsets = [0, 32], sizes = [8, 32], strides = [1, 1]} : vector<8x128xf32> to vector<8x32xf32>
    %235 = vector.extract_strided_slice %232 {offsets = [0, 64], sizes = [8, 32], strides = [1, 1]} : vector<8x128xf32> to vector<8x32xf32>
    %236 = vector.extract_strided_slice %231 {offsets = [0, 96], sizes = [8, 32], strides = [1, 1]} : vector<8x128xf32> to vector<8x32xf32>
    %237 = arith.mulf %234, %221 : vector<8x32xf32>
    %238 = arith.mulf %233, %235 : vector<8x32xf32>
    %239 = arith.addf %237, %238 : vector<8x32xf32>
    %240 = math.tanh %239 : vector<8x32xf32>
    %241 = arith.mulf %236, %240 : vector<8x32xf32>
    %c1_i32_86 = arith.constant 1 : i32
    %242 = arith.index_cast %c1_i32_86 : i32 to index
    %c0_87 = arith.constant 0 : index
    %c0_88 = arith.constant 0 : index
    %243 = vector.load %arg7[%242, %c0_87, %c0_88] : memref<8x8x128xf32, #tpu.memory_space<vmem>>, vector<1x8x128xf32>
    %244 = vector.shape_cast %243 : vector<1x8x128xf32> to vector<8x128xf32>
    %cst_89 = arith.constant dense<0.000000e+00> : vector<8x128xf32>
    %245 = tpu.matmul %241, %219, %cst_89 {dimension_numbers = #tpu.dot_dimension_numbers<[1], [0], [0], [1], [0, 0, 1, 1], [], []>} : vector<8x32xf32>, vector<32x128xf32>, vector<8x128xf32> -> vector<8x128xf32>
    %246 = arith.addf %244, %245 : vector<8x128xf32>
    %247 = arith.negf %246 : vector<8x128xf32>
    %248 = math.exp %247 : vector<8x128xf32>
    %cst_90 = arith.constant 1.000000e+00 : f32
    %249 = vector.broadcast %cst_90 : f32 to vector<8x128xf32>
    %250 = arith.addf %249, %248 : vector<8x128xf32>
    %251 = arith.divf %249, %250 : vector<8x128xf32>
    %252 = math.tanh %246 : vector<8x128xf32>
    %253 = vector.extract_strided_slice %251 {offsets = [0, 0], sizes = [8, 32], strides = [1, 1]} : vector<8x128xf32> to vector<8x32xf32>
    %254 = vector.extract_strided_slice %251 {offsets = [0, 32], sizes = [8, 32], strides = [1, 1]} : vector<8x128xf32> to vector<8x32xf32>
    %255 = vector.extract_strided_slice %252 {offsets = [0, 64], sizes = [8, 32], strides = [1, 1]} : vector<8x128xf32> to vector<8x32xf32>
    %256 = vector.extract_strided_slice %251 {offsets = [0, 96], sizes = [8, 32], strides = [1, 1]} : vector<8x128xf32> to vector<8x32xf32>
    %257 = arith.mulf %254, %239 : vector<8x32xf32>
    %258 = arith.mulf %253, %255 : vector<8x32xf32>
    %259 = arith.addf %257, %258 : vector<8x32xf32>
    %260 = math.tanh %259 : vector<8x32xf32>
    %261 = arith.mulf %256, %260 : vector<8x32xf32>
    %c2_i32_91 = arith.constant 2 : i32
    %262 = arith.index_cast %c2_i32_91 : i32 to index
    %c0_92 = arith.constant 0 : index
    %c0_93 = arith.constant 0 : index
    %263 = vector.load %arg7[%262, %c0_92, %c0_93] : memref<8x8x128xf32, #tpu.memory_space<vmem>>, vector<1x8x128xf32>
    %264 = vector.shape_cast %263 : vector<1x8x128xf32> to vector<8x128xf32>
    %cst_94 = arith.constant dense<0.000000e+00> : vector<8x128xf32>
    %265 = tpu.matmul %261, %219, %cst_94 {dimension_numbers = #tpu.dot_dimension_numbers<[1], [0], [0], [1], [0, 0, 1, 1], [], []>} : vector<8x32xf32>, vector<32x128xf32>, vector<8x128xf32> -> vector<8x128xf32>
    %266 = arith.addf %264, %265 : vector<8x128xf32>
    %267 = arith.negf %266 : vector<8x128xf32>
    %268 = math.exp %267 : vector<8x128xf32>
    %cst_95 = arith.constant 1.000000e+00 : f32
    %269 = vector.broadcast %cst_95 : f32 to vector<8x128xf32>
    %270 = arith.addf %269, %268 : vector<8x128xf32>
    %271 = arith.divf %269, %270 : vector<8x128xf32>
    %272 = math.tanh %266 : vector<8x128xf32>
    %273 = vector.extract_strided_slice %271 {offsets = [0, 0], sizes = [8, 32], strides = [1, 1]} : vector<8x128xf32> to vector<8x32xf32>
    %274 = vector.extract_strided_slice %271 {offsets = [0, 32], sizes = [8, 32], strides = [1, 1]} : vector<8x128xf32> to vector<8x32xf32>
    %275 = vector.extract_strided_slice %272 {offsets = [0, 64], sizes = [8, 32], strides = [1, 1]} : vector<8x128xf32> to vector<8x32xf32>
    %276 = vector.extract_strided_slice %271 {offsets = [0, 96], sizes = [8, 32], strides = [1, 1]} : vector<8x128xf32> to vector<8x32xf32>
    %277 = arith.mulf %274, %259 : vector<8x32xf32>
    %278 = arith.mulf %273, %275 : vector<8x32xf32>
    %279 = arith.addf %277, %278 : vector<8x32xf32>
    %280 = math.tanh %279 : vector<8x32xf32>
    %281 = arith.mulf %276, %280 : vector<8x32xf32>
    %c3_i32_96 = arith.constant 3 : i32
    %282 = arith.index_cast %c3_i32_96 : i32 to index
    %c0_97 = arith.constant 0 : index
    %c0_98 = arith.constant 0 : index
    %283 = vector.load %arg7[%282, %c0_97, %c0_98] : memref<8x8x128xf32, #tpu.memory_space<vmem>>, vector<1x8x128xf32>
    %284 = vector.shape_cast %283 : vector<1x8x128xf32> to vector<8x128xf32>
    %cst_99 = arith.constant dense<0.000000e+00> : vector<8x128xf32>
    %285 = tpu.matmul %281, %219, %cst_99 {dimension_numbers = #tpu.dot_dimension_numbers<[1], [0], [0], [1], [0, 0, 1, 1], [], []>} : vector<8x32xf32>, vector<32x128xf32>, vector<8x128xf32> -> vector<8x128xf32>
    %286 = arith.addf %284, %285 : vector<8x128xf32>
    %287 = arith.negf %286 : vector<8x128xf32>
    %288 = math.exp %287 : vector<8x128xf32>
    %cst_100 = arith.constant 1.000000e+00 : f32
    %289 = vector.broadcast %cst_100 : f32 to vector<8x128xf32>
    %290 = arith.addf %289, %288 : vector<8x128xf32>
    %291 = arith.divf %289, %290 : vector<8x128xf32>
    %292 = math.tanh %286 : vector<8x128xf32>
    %293 = vector.extract_strided_slice %291 {offsets = [0, 0], sizes = [8, 32], strides = [1, 1]} : vector<8x128xf32> to vector<8x32xf32>
    %294 = vector.extract_strided_slice %291 {offsets = [0, 32], sizes = [8, 32], strides = [1, 1]} : vector<8x128xf32> to vector<8x32xf32>
    %295 = vector.extract_strided_slice %292 {offsets = [0, 64], sizes = [8, 32], strides = [1, 1]} : vector<8x128xf32> to vector<8x32xf32>
    %296 = vector.extract_strided_slice %291 {offsets = [0, 96], sizes = [8, 32], strides = [1, 1]} : vector<8x128xf32> to vector<8x32xf32>
    %297 = arith.mulf %294, %279 : vector<8x32xf32>
    %298 = arith.mulf %293, %295 : vector<8x32xf32>
    %299 = arith.addf %297, %298 : vector<8x32xf32>
    %300 = math.tanh %299 : vector<8x32xf32>
    %301 = arith.mulf %296, %300 : vector<8x32xf32>
    %c4_i32_101 = arith.constant 4 : i32
    %302 = arith.index_cast %c4_i32_101 : i32 to index
    %c0_102 = arith.constant 0 : index
    %c0_103 = arith.constant 0 : index
    %303 = vector.load %arg7[%302, %c0_102, %c0_103] : memref<8x8x128xf32, #tpu.memory_space<vmem>>, vector<1x8x128xf32>
    %304 = vector.shape_cast %303 : vector<1x8x128xf32> to vector<8x128xf32>
    %cst_104 = arith.constant dense<0.000000e+00> : vector<8x128xf32>
    %305 = tpu.matmul %301, %219, %cst_104 {dimension_numbers = #tpu.dot_dimension_numbers<[1], [0], [0], [1], [0, 0, 1, 1], [], []>} : vector<8x32xf32>, vector<32x128xf32>, vector<8x128xf32> -> vector<8x128xf32>
    %306 = arith.addf %304, %305 : vector<8x128xf32>
    %307 = arith.negf %306 : vector<8x128xf32>
    %308 = math.exp %307 : vector<8x128xf32>
    %cst_105 = arith.constant 1.000000e+00 : f32
    %309 = vector.broadcast %cst_105 : f32 to vector<8x128xf32>
    %310 = arith.addf %309, %308 : vector<8x128xf32>
    %311 = arith.divf %309, %310 : vector<8x128xf32>
    %312 = math.tanh %306 : vector<8x128xf32>
    %313 = vector.extract_strided_slice %311 {offsets = [0, 0], sizes = [8, 32], strides = [1, 1]} : vector<8x128xf32> to vector<8x32xf32>
    %314 = vector.extract_strided_slice %311 {offsets = [0, 32], sizes = [8, 32], strides = [1, 1]} : vector<8x128xf32> to vector<8x32xf32>
    %315 = vector.extract_strided_slice %312 {offsets = [0, 64], sizes = [8, 32], strides = [1, 1]} : vector<8x128xf32> to vector<8x32xf32>
    %316 = vector.extract_strided_slice %311 {offsets = [0, 96], sizes = [8, 32], strides = [1, 1]} : vector<8x128xf32> to vector<8x32xf32>
    %317 = arith.mulf %314, %299 : vector<8x32xf32>
    %318 = arith.mulf %313, %315 : vector<8x32xf32>
    %319 = arith.addf %317, %318 : vector<8x32xf32>
    %320 = math.tanh %319 : vector<8x32xf32>
    %321 = arith.mulf %316, %320 : vector<8x32xf32>
    %c5_i32_106 = arith.constant 5 : i32
    %322 = arith.index_cast %c5_i32_106 : i32 to index
    %c0_107 = arith.constant 0 : index
    %c0_108 = arith.constant 0 : index
    %323 = vector.load %arg7[%322, %c0_107, %c0_108] : memref<8x8x128xf32, #tpu.memory_space<vmem>>, vector<1x8x128xf32>
    %324 = vector.shape_cast %323 : vector<1x8x128xf32> to vector<8x128xf32>
    %cst_109 = arith.constant dense<0.000000e+00> : vector<8x128xf32>
    %325 = tpu.matmul %321, %219, %cst_109 {dimension_numbers = #tpu.dot_dimension_numbers<[1], [0], [0], [1], [0, 0, 1, 1], [], []>} : vector<8x32xf32>, vector<32x128xf32>, vector<8x128xf32> -> vector<8x128xf32>
    %326 = arith.addf %324, %325 : vector<8x128xf32>
    %327 = arith.negf %326 : vector<8x128xf32>
    %328 = math.exp %327 : vector<8x128xf32>
    %cst_110 = arith.constant 1.000000e+00 : f32
    %329 = vector.broadcast %cst_110 : f32 to vector<8x128xf32>
    %330 = arith.addf %329, %328 : vector<8x128xf32>
    %331 = arith.divf %329, %330 : vector<8x128xf32>
    %332 = math.tanh %326 : vector<8x128xf32>
    %333 = vector.extract_strided_slice %331 {offsets = [0, 0], sizes = [8, 32], strides = [1, 1]} : vector<8x128xf32> to vector<8x32xf32>
    %334 = vector.extract_strided_slice %331 {offsets = [0, 32], sizes = [8, 32], strides = [1, 1]} : vector<8x128xf32> to vector<8x32xf32>
    %335 = vector.extract_strided_slice %332 {offsets = [0, 64], sizes = [8, 32], strides = [1, 1]} : vector<8x128xf32> to vector<8x32xf32>
    %336 = vector.extract_strided_slice %331 {offsets = [0, 96], sizes = [8, 32], strides = [1, 1]} : vector<8x128xf32> to vector<8x32xf32>
    %337 = arith.mulf %334, %319 : vector<8x32xf32>
    %338 = arith.mulf %333, %335 : vector<8x32xf32>
    %339 = arith.addf %337, %338 : vector<8x32xf32>
    %340 = math.tanh %339 : vector<8x32xf32>
    %341 = arith.mulf %336, %340 : vector<8x32xf32>
    %c6_i32_111 = arith.constant 6 : i32
    %342 = arith.index_cast %c6_i32_111 : i32 to index
    %c0_112 = arith.constant 0 : index
    %c0_113 = arith.constant 0 : index
    %343 = vector.load %arg7[%342, %c0_112, %c0_113] : memref<8x8x128xf32, #tpu.memory_space<vmem>>, vector<1x8x128xf32>
    %344 = vector.shape_cast %343 : vector<1x8x128xf32> to vector<8x128xf32>
    %cst_114 = arith.constant dense<0.000000e+00> : vector<8x128xf32>
    %345 = tpu.matmul %341, %219, %cst_114 {dimension_numbers = #tpu.dot_dimension_numbers<[1], [0], [0], [1], [0, 0, 1, 1], [], []>} : vector<8x32xf32>, vector<32x128xf32>, vector<8x128xf32> -> vector<8x128xf32>
    %346 = arith.addf %344, %345 : vector<8x128xf32>
    %347 = arith.negf %346 : vector<8x128xf32>
    %348 = math.exp %347 : vector<8x128xf32>
    %cst_115 = arith.constant 1.000000e+00 : f32
    %349 = vector.broadcast %cst_115 : f32 to vector<8x128xf32>
    %350 = arith.addf %349, %348 : vector<8x128xf32>
    %351 = arith.divf %349, %350 : vector<8x128xf32>
    %352 = math.tanh %346 : vector<8x128xf32>
    %353 = vector.extract_strided_slice %351 {offsets = [0, 0], sizes = [8, 32], strides = [1, 1]} : vector<8x128xf32> to vector<8x32xf32>
    %354 = vector.extract_strided_slice %351 {offsets = [0, 32], sizes = [8, 32], strides = [1, 1]} : vector<8x128xf32> to vector<8x32xf32>
    %355 = vector.extract_strided_slice %352 {offsets = [0, 64], sizes = [8, 32], strides = [1, 1]} : vector<8x128xf32> to vector<8x32xf32>
    %356 = vector.extract_strided_slice %351 {offsets = [0, 96], sizes = [8, 32], strides = [1, 1]} : vector<8x128xf32> to vector<8x32xf32>
    %357 = arith.mulf %354, %339 : vector<8x32xf32>
    %358 = arith.mulf %353, %355 : vector<8x32xf32>
    %359 = arith.addf %357, %358 : vector<8x32xf32>
    %360 = math.tanh %359 : vector<8x32xf32>
    %361 = arith.mulf %356, %360 : vector<8x32xf32>
    %c7_i32_116 = arith.constant 7 : i32
    %362 = arith.index_cast %c7_i32_116 : i32 to index
    %c0_117 = arith.constant 0 : index
    %c0_118 = arith.constant 0 : index
    %363 = vector.load %arg7[%362, %c0_117, %c0_118] : memref<8x8x128xf32, #tpu.memory_space<vmem>>, vector<1x8x128xf32>
    %364 = vector.shape_cast %363 : vector<1x8x128xf32> to vector<8x128xf32>
    %cst_119 = arith.constant dense<0.000000e+00> : vector<8x128xf32>
    %365 = tpu.matmul %361, %219, %cst_119 {dimension_numbers = #tpu.dot_dimension_numbers<[1], [0], [0], [1], [0, 0, 1, 1], [], []>} : vector<8x32xf32>, vector<32x128xf32>, vector<8x128xf32> -> vector<8x128xf32>
    %366 = arith.addf %364, %365 : vector<8x128xf32>
    %367 = arith.negf %366 : vector<8x128xf32>
    %368 = math.exp %367 : vector<8x128xf32>
    %cst_120 = arith.constant 1.000000e+00 : f32
    %369 = vector.broadcast %cst_120 : f32 to vector<8x128xf32>
    %370 = arith.addf %369, %368 : vector<8x128xf32>
    %371 = arith.divf %369, %370 : vector<8x128xf32>
    %372 = math.tanh %366 : vector<8x128xf32>
    %373 = vector.extract_strided_slice %371 {offsets = [0, 0], sizes = [8, 32], strides = [1, 1]} : vector<8x128xf32> to vector<8x32xf32>
    %374 = vector.extract_strided_slice %371 {offsets = [0, 32], sizes = [8, 32], strides = [1, 1]} : vector<8x128xf32> to vector<8x32xf32>
    %375 = vector.extract_strided_slice %372 {offsets = [0, 64], sizes = [8, 32], strides = [1, 1]} : vector<8x128xf32> to vector<8x32xf32>
    %376 = vector.extract_strided_slice %371 {offsets = [0, 96], sizes = [8, 32], strides = [1, 1]} : vector<8x128xf32> to vector<8x32xf32>
    %377 = arith.mulf %374, %359 : vector<8x32xf32>
    %378 = arith.mulf %373, %375 : vector<8x32xf32>
    %379 = arith.addf %377, %378 : vector<8x32xf32>
    %380 = math.tanh %379 : vector<8x32xf32>
    %381 = arith.mulf %376, %380 : vector<8x32xf32>
    %c8_i32_121 = arith.constant 8 : i32
    %c0_122 = arith.constant 0 : index
    %c0_123 = arith.constant 0 : index
    %382 = vector.load %arg4[%c0_122, %c0_123] : memref<32x8xf32, #tpu.memory_space<vmem>>, vector<32x8xf32>
    %cst_124 = arith.constant dense<0.000000e+00> : vector<8x8xf32>
    %383 = tpu.matmul %381, %382, %cst_124 {dimension_numbers = #tpu.dot_dimension_numbers<[1], [0], [0], [1], [0, 0, 1, 1], [], []>} : vector<8x32xf32>, vector<32x8xf32>, vector<8x8xf32> -> vector<8x8xf32>
    %c0_125 = arith.constant 0 : index
    %c0_126 = arith.constant 0 : index
    %384 = vector.load %arg5[%c0_125, %c0_126] : memref<1x8xf32, #tpu.memory_space<vmem>>, vector<1x8xf32>
    %385 = vector.broadcast %384 : vector<1x8xf32> to vector<8x8xf32>
    %386 = arith.addf %383, %385 : vector<8x8xf32>
    %387 = arith.negf %386 : vector<8x8xf32>
    %388 = math.exp %387 : vector<8x8xf32>
    %cst_127 = arith.constant 1.000000e+00 : f32
    %389 = vector.broadcast %cst_127 : f32 to vector<8x8xf32>
    %390 = arith.addf %389, %388 : vector<8x8xf32>
    %391 = arith.divf %389, %390 : vector<8x8xf32>
    %c0_128 = arith.constant 0 : index
    %c0_129 = arith.constant 0 : index
    %392 = vector.load %arg6[%c0_128, %c0_129] : memref<8x8xf32, #tpu.memory_space<vmem>>, vector<8x8xf32>
    tpu.vector_store %arg6[%c0_128, %c0_129], %391 {strides = array<i32>} : memref<8x8xf32, #tpu.memory_space<vmem>>, vector<8x8xf32>,
    return
  }
}

</mosaic_0001>

<bundles_post_ra>
// kernel: tpu_custom_call.1
= control target key start
LH: loop header
LB: loop body
LE: loop exit
PB: predicated region body
PF: predicated region fallthrough
CT: control target
= control target key end

     0   :  { %11 = vsyncpa [#allocation5], 0  ;;  %s3285_s0 = inlined_call_operand.hbm [shape: f32[8,8,32], index: 0, kind: input, shape index: {}]   ;;  %s3286_s1 = inlined_call_operand.hbm [shape: f32[2,32,128], index: 1, kind: input, shape index: {}]   ;;  %s3287_s2 = inlined_call_operand.hbm [shape: f32[2,32,128], index: 2, kind: input, shape index: {}]   ;;  %s3288_s3 = inlined_call_operand.vmem [shape: f32[2,1,128], index: 3, kind: input, shape index: {}]   ;;  %s3289_s4 = inlined_call_operand.vmem [shape: f32[32,8], index: 4, kind: input, shape index: {}]   ;;  %s3290_s5 = inlined_call_operand.vmem [shape: f32[1,8], index: 5, kind: input, shape index: {}]   ;;  %s3291_s6 = inlined_call_operand.hbm [shape: f32[8,8], index: 6, kind: output, shape index: {}]  }
   0x1   :  { %12 = vsyncpa [#allocation8], 0 }
   0x2   :  { %13 = vsyncpa [#allocation6], 0  ;;  %s2884_s21 = smov [#allocation7]   ;;  %s2885_s23 = smov [#allocation4]  }
   0x3   :  { %s31_s22 = sshll.u32 %s2884_s21, 4  ;;  %s19_s24 = sshll.u32 %s2885_s23, 4  ;;  %s32_s22 = int_to_ptr.vmem [resolvable:$true] %s31_s22  ;;  %s2930_s24 = int_to_ptr.vmem [resolvable:$true] %s19_s24 }
   0x4   :  { %s2790_s27 = scalar_lea.hbm %s3286_s1, 1024 }
   0x5   :  { %p2791_p0 = scmp.ne.s32.totalorder %s3286_s1, %s2790_s27  ;;  %p2794_p1 = scmp.lt.u32.totalorder %s2790_s27, %s3286_s1 }
   0x7   :  { %p2796_p2 = pnand %p2794_p1, %p2791_p0 }
   0x9   :  { %2799 = shalt.err (!%p2796_p2)
}
   0xa   :  { %s2800_s8 = scalar_lea.vmem %s32_s22, 1024  ;;  %p2805_p4 = scmp.lt.s32.totalorder %s32_s22, %s32_s22 }
   0xb   :  { %p2801_p3 = scmp.ne.s32.totalorder %s32_s22, %s2800_s8  ;;  %p2806_p5 = scmp.lt.s32.totalorder %s2800_s8, %s2800_s8 }
   0xd   :  { %p2807_p6 = por %p2806_p5, %p2805_p4 }
   0xf   :  { %p2808_p7 = pnand %p2807_p6, %p2801_p3 }
  0x11   :  { %2811 = shalt.err (!%p2808_p7)
}
  0x12   :  { %s2886_s9 = smov 128   ;;  %s2887_s10 = smov 8  }
  0x13   :  { %37 = dma.hbm_to_vmem [thread:$0]  %s3286_s1, 1024, %s32_s22, [#allocation8], %s2886_s9, %s2886_s9, %s2887_s10  }
  0x14   :  { %s2812_s15 = scalar_lea.hbm %s3285_s0, 1024 }
  0x15   :  { %p2813_p8 = scmp.ne.s32.totalorder %s3285_s0, %s2812_s15  ;;  %p2816_p9 = scmp.lt.u32.totalorder %s2812_s15, %s3285_s0 }
  0x17   :  { %p2818_p10 = pnand %p2816_p9, %p2813_p8 }
  0x19   :  { %2821 = shalt.err (!%p2818_p10)
}
  0x1a   :  { %s2822_s20 = scalar_lea.vmem %s2930_s24, 1024  ;;  %p2827_p12 = scmp.lt.s32.totalorder %s2930_s24, %s2930_s24 }
  0x1b   :  { %p2823_p11 = scmp.ne.s32.totalorder %s2930_s24, %s2822_s20  ;;  %p2828_p13 = scmp.lt.s32.totalorder %s2822_s20, %s2822_s20 }
  0x1d   :  { %p2829_p0 = por %p2828_p13, %p2827_p12 }
  0x1f   :  { %p2830_p1 = pnand %p2829_p0, %p2823_p11 }
  0x21   :  { %2833 = shalt.err (!%p2830_p1)
}
  0x22   :  { %25 = dma.hbm_to_vmem [thread:$0]  %s3285_s0, 1024, %s2930_s24, [#allocation5], %s2886_s9, %s2886_s9, %s2887_s10  }
  0x23   :  { %s2888_s22 = smov [#allocation9]   ;;  %s2834_s27 = scalar_lea.hbm %s3287_s2, 1024 }
  0x24   :  { %s43_s23 = sshll.u32 %s2888_s22, 4  ;;  %p2835_p2 = scmp.ne.s32.totalorder %s3287_s2, %s2834_s27  ;;  %s44_s23 = int_to_ptr.vmem [resolvable:$true] %s43_s23 }
  0x25   :  { %p2838_p3 = scmp.lt.u32.totalorder %s2834_s27, %s3287_s2 }
  0x27   :  { %p2840_p4 = pnand %p2838_p3, %p2835_p2 }
  0x29   :  { %2843 = shalt.err (!%p2840_p4)
}
  0x2a   :  { %s2844_s8 = scalar_lea.vmem %s44_s23, 1024  ;;  %p2849_p6 = scmp.lt.s32.totalorder %s44_s23, %s44_s23 }
  0x2b   :  { %p2845_p5 = scmp.ne.s32.totalorder %s44_s23, %s2844_s8  ;;  %p2850_p7 = scmp.lt.s32.totalorder %s2844_s8, %s2844_s8 }
  0x2d   :  { %p2851_p8 = por %p2850_p7, %p2849_p6 }
  0x2f   :  { %p2852_p9 = pnand %p2851_p8, %p2845_p5 }
  0x31   :  { %2855 = shalt.err (!%p2852_p9)
}
  0x32   :  { %49 = dma.hbm_to_vmem [thread:$0]  %s3287_s2, 1024, %s44_s23, [#allocation8], %s2886_s9, %s2886_s9, %s2887_s10  }
  0x33   :  { %2878 = dma.done.wait [#allocation5], 1024  }
  0x34   :  { %2879 = vsyncadd [#allocation5], 4294966272 }
  0x35   :  { %2880 = dma.done.wait [#allocation8], 2048  }
  0x36   :  { %2881 = vsyncadd [#allocation8], 4294965248  ;;  %v2889_v0 = vmov 0.0|0.0   ;;  %vm2890_vm0 = vmmov 0   ;;  %v2891_v1 = vmov 0.0   ;;  %v73_v2 = vld [vmem:[#allocation7] sm:$0xff] }
  0x37   :  { %2537 = vmatprep.subr.bf16.mxu1 %v2889_v0  ;;  %2330 = vmatprep.mubr.msk.f32.mxu1 %vm2890_vm0, %v2891_v1  ;;  %v74_v3 = vld [vmem:[#allocation7 + $0x8] sm:$0xff]  ;;  %v222_v4 = vld [vmem:[#allocation9] sm:$0xff]  ;;  %vm84_vm1 = vcmask 261120   ;;  %v75_v7 = vld [vmem:[#allocation7 + $0x10] sm:$0xff]  ;;  %s2892_s10 = smov 64   ;;  %s2893_s11 = smov 32  }
  0x38   :  { %v2529_v5 = vpack.c.bf16 %v74_v3, %v73_v2  ;;  %v223_v6 = vld [vmem:[#allocation9 + $0x8] sm:$0xff]  ;;  %v76_v8 = vld [vmem:[#allocation7 + $0x18] sm:$0xff]  ;;  %v65_v11 = vld [vmem:[#allocation4] sm:$0xff]  ;;  %vm2123_vm2 = vcmask 64512  }
  0x39   :  { %v2985_v9 = vpack.c.bf16 %v223_v6, %v222_v4  ;;  %v2533_v10 = vpack.c.bf16 %v76_v8, %v75_v7  ;;  %v224_v12 = vld [vmem:[#allocation9 + $0x10] sm:$0xff]  ;;  %v225_v13 = vld [vmem:[#allocation9 + $0x18] sm:$0xff]  ;;  %2310 = vmatprep.mubr.msk.f32.mxu0 %vm84_vm1, %v65_v11  ;;  %v66_v15 = vld [vmem:[#allocation4 + $0x8] sm:$0xff] }
  0x3a   :  { %2530 = vmatprep.subr.bf16.mxu0 %v2529_v5  ;;  %v2989_v14 = vpack.c.bf16 %v225_v13, %v224_v12  ;;  %v3010_v16 = vld [vmem:[%s3288_s3] ss:$0 sm:$0xff]  ;;  %v67_v51 = vld [vmem:[#allocation4 + $0x10] sm:$0xff]  ;;  %v68_v52 = vld [vmem:[#allocation4 + $0x18] sm:$0xff] }
  0x3b   :  { %2532 = vmatpush3.bf16.msra.mxu0 %v2529_v5  ;;  %2539 = vmatpush3.bf16.msra.mxu1 %v2985_v9  ;;  %v69_v53 = vld [vmem:[#allocation4 + $0x20] sm:$0xff]  ;;  %v70_v54 = vld [vmem:[#allocation4 + $0x28] sm:$0xff]  ;;  %v71_v55 = vld [vmem:[#allocation4 + $0x30] sm:$0xff] }
  0x3c   :  { %2534 = vmatprep.subr.bf16.mxu0 %v2533_v10  ;;  %2540 = vmatprep.subr.bf16.mxu1 %v2889_v0  ;;  %v72_v56 = vld [vmem:[#allocation4 + $0x38] sm:$0xff] }
  0x3f   :  { %2536 = vmatpush3.bf16.msra.mxu0 %v2533_v10  ;;  %2542 = vmatpush3.bf16.msra.mxu1 %v2989_v14 }
  0x40   :  { %2543 = vmatprep.subr.bf16.mxu1 %v2889_v0  ;;  %2549 = vmatprep.subr.bf16.mxu0 %v2889_v0 }
  0x42   :  { %2311 = vmatmul.mubr.msk.f32.vlgmr.msra.gmra.mrb[0].mxu0 %vm84_vm1, %v66_v15  ;;  %2331 = vmatmul.mubr.f32.vlgmr.msra.gmra.mrb[0].mxu1 %v2891_v1 }
  0x43   :  { %2545 = vmatpush3.bf16.msra.mxu1 %v2985_v9  ;;  %2341 = vmatprep.mubr.msk.f32.mxu1 %vm2890_vm0, %v2891_v1 }
  0x44   :  { %2546 = vmatprep.subr.bf16.mxu1 %v2889_v0  ;;  %2551 = vmatpush3.bf16.msra.mxu0 %v2985_v9 }
  0x45   :  { %2552 = vmatprep.subr.bf16.mxu0 %v2889_v0  ;;  %2313 = vmatprep.mubr.msk.f32.mxu0 %vm84_vm1, %v67_v51 }
  0x46   :  { %2314 = vmatmul.mubr.msk.f32.gmra.mrb[2].mxu0 %vm84_vm1, %v68_v52 }
  0x47   :  { %2548 = vmatpush3.bf16.msra.mxu1 %v2989_v14  ;;  %2316 = vmatprep.mubr.msk.f32.mxu0 %vm84_vm1, %v69_v53 }
  0x48   :  { %2554 = vmatpush3.bf16.msra.mxu0 %v2989_v14  ;;  %2555 = vmatprep.subr.bf16.mxu1 %v2889_v0 }
  0x49   :  { %2561 = vmatprep.subr.bf16.mxu0 %v2889_v0 }
  0x4a   :  { %2317 = vmatmul.mubr.msk.f32.gmra.mrb[4].mxu0 %vm84_vm1, %v70_v54 }
  0x4b   :  { %2319 = vmatprep.mubr.msk.f32.mxu0 %vm84_vm1, %v71_v55 }
  0x4e   :  { %2320 = vmatmul.mubr.msk.f32.gmra.mrb[6].mxu0 %vm84_vm1, %v72_v56 }
  0x4f   :  { %2352 = vmatprep.mubr.msk.f32.mxu0 %vm2890_vm0, %v2891_v1 }
 0x115   :  { %v2312_v17 = vpop.f32.mrb[0].mxu0  ;;  %v296_v18 = vpop.f32.mrb[0].mxu1 }
 0x116   :  { %v175_v19 = vpop.f32.mrb[1].mxu0  ;;  %v2332_v20 = vpop.f32.mrb[1].mxu1  ;;  %v181_v37 = vadd.f32 %v2312_v17, %v3010_v16 }
 0x117   :  { %v176_v21 = vadd.f32 %v3010_v16, %v175_v19 }
 0x119   :  { %v300_v22 = vadd.f32 %v296_v18, %v176_v21  ;;  %v2315_v60 = vpop.f32.mrb[2].mxu0 }
 0x11a   :  { %v185_v61 = vpop.f32.mrb[3].mxu0 }
 0x11b   :  { %2658 = vtanh.f32 %v300_v22  ;;  %v2150_v24 = vmul.f32 -1.442695, %v300_v22  ;;  %v186_v5 = vadd.f32 %v3010_v16, %v185_v61 }
 0x11d   :  { %2660 = vpow2.f32 %v2150_v24  ;;  %v3038_v62 = vpop.f32.mrb[4].mxu0 }
 0x11e   :  { %v3040_v63 = vpop.f32.mrb[5].mxu0 }
 0x121   :  { %v3042_v2 = vpop.f32.mrb[6].mxu0 }
 0x122   :  { %v3044_v3 = vpop.f32.mrb[7].mxu0 }
 0x125   :  { %v2659_v23 = vpop.eup %2658 }
 0x126   :  { %310 = vrot.lane.b32.xlu0 %v2659_v23, %s2892_s10 }
 0x127   :  { %v2661_v25 = vpop.eup %2660 }
 0x128   :  { %v304_v26 = vadd.f32 1.0, %v2661_v25 }
 0x12a   :  { %2662 = vrcp.f32 %v304_v26  ;;  %v191_v26 = vadd.f32 %v2315_v60, %v3010_v16 }
 0x134   :  { %v2663_v27 = vpop.eup %2662 }
 0x135   :  { %v308_v30 = vmul.f32 0.0, %v2663_v27 }
 0x198   :  { %v311_v28 = vpop.permute.xlu0 %310 }
 0x199   :  { %v313_v29 = vmul.f32 %v2663_v27, %v311_v28 }
 0x19b   :  { %315 = vrot.lane.b32.xlu0 %v313_v29, %s2893_s11 }
 0x20d   :  { %v316_v31 = vpop.permute.xlu0 %315 }
 0x20e   :  { %v318_v32 = vadd.f32 %v316_v31, %v308_v30 }
 0x210   :  { %2664 = vtanh.f32 %v318_v32 }
 0x21a   :  { %v2665_v33 = vpop.eup %2664 }
 0x21b   :  { %321 = vrot.lane.b32.xlu1 %v2665_v33, %s2892_s10 }
 0x28d   :  { %v322_v34 = vpop.permute.xlu1 %321 }
 0x28e   :  { %v324_v35 = vmul.f32 %v2663_v27, %v322_v34 }
 0x290   :  { %326 = vrot.lane.b32.xlu1 %v324_v35, %s2893_s11 }
 0x302   :  { %v327_v36 = vpop.permute.xlu1 %326 }
 0x303   :  { %329 = vst.msk [vmem:[#allocation3] sm:$0xff] %vm84_vm1, %v327_v36  ;;  %2342 = vmatmul.mubr.msk.f32.vlgmr.msra.gmra.mrb[2].mxu1 %vm84_vm1, %v327_v36 }
 0x304   :  { %2557 = vmatpush3.bf16.msra.mxu1 %v2985_v9  ;;  %2363 = vmatprep.mubr.msk.f32.mxu1 %vm2890_vm0, %v2891_v1 }
 0x305   :  { %2558 = vmatprep.subr.bf16.mxu1 %v2889_v0 }
 0x308   :  { %2560 = vmatpush3.bf16.msra.mxu1 %v2989_v14 }
 0x309   :  { %2567 = vmatprep.subr.bf16.mxu1 %v2889_v0 }
 0x3d6   :  { %v400_v38 = vpop.f32.mrb[2].mxu1 }
 0x3d7   :  { %v404_v39 = vadd.f32 %v400_v38, %v181_v37  ;;  %v2343_v40 = vpop.f32.mrb[3].mxu1 }
 0x3d9   :  { %2666 = vtanh.f32 %v404_v39  ;;  %v2152_v42 = vmul.f32 -1.442695, %v404_v39 }
 0x3db   :  { %2668 = vpow2.f32 %v2152_v42 }
 0x3e3   :  { %v2667_v41 = vpop.eup %2666 }
 0x3e4   :  { %414 = vrot.lane.b32.xlu0 %v2667_v41, %s2892_s10 }
 0x3e5   :  { %v2669_v43 = vpop.eup %2668 }
 0x3e6   :  { %v408_v44 = vadd.f32 1.0, %v2669_v43 }
 0x3e8   :  { %2670 = vrcp.f32 %v408_v44  ;;  %v196_v44 = vadd.f32 %v3010_v16, %v3040_v63  ;;  %v201_v63 = vadd.f32 %v3038_v62, %v3010_v16 }
 0x3f2   :  { %v2671_v45 = vpop.eup %2670 }
 0x3f3   :  { %v412_v48 = vmul.f32 %v2671_v45, %v318_v32 }
 0x456   :  { %v415_v46 = vpop.permute.xlu0 %414 }
 0x457   :  { %v417_v47 = vmul.f32 %v2671_v45, %v415_v46 }
 0x459   :  { %419 = vrot.lane.b32.xlu1 %v417_v47, %s2893_s11 }
 0x4cb   :  { %v420_v49 = vpop.permute.xlu1 %419 }
 0x4cc   :  { %v422_v50 = vadd.f32 %v420_v49, %v412_v48 }
 0x4ce   :  { %2672 = vtanh.f32 %v422_v50 }
 0x4d8   :  { %v2673_v57 = vpop.eup %2672 }
 0x4d9   :  { %425 = vrot.lane.b32.xlu0 %v2673_v57, %s2892_s10 }
 0x54b   :  { %v426_v58 = vpop.permute.xlu0 %425 }
 0x54c   :  { %v428_v59 = vmul.f32 %v2671_v45, %v426_v58 }
 0x54e   :  { %430 = vrot.lane.b32.xlu1 %v428_v59, %s2893_s11 }
 0x5c0   :  { %v431_v4 = vpop.permute.xlu1 %430 }
 0x5c1   :  { %434 = vst.msk [vmem:[#allocation3 + $0x8] sm:$0xff] %vm84_vm1, %v431_v4  ;;  %2353 = vmatmul.mubr.msk.f32.vlgmr.msra.gmra.mrb[8].mxu0 %vm84_vm1, %v431_v4 }
 0x5c2   :  { %2563 = vmatpush3.bf16.msra.mxu0 %v2985_v9  ;;  %2374 = vmatprep.mubr.msk.f32.mxu0 %vm2890_vm0, %v2891_v1 }
 0x5c3   :  { %2564 = vmatprep.subr.bf16.mxu0 %v2889_v0 }
 0x5c6   :  { %2566 = vmatpush3.bf16.msra.mxu0 %v2989_v14 }
 0x5c7   :  { %2573 = vmatprep.subr.bf16.mxu0 %v2889_v0 }
 0x694   :  { %v505_v6 = vpop.f32.mrb[8].mxu0 }
 0x695   :  { %v509_v7 = vadd.f32 %v505_v6, %v186_v5  ;;  %v2354_v8 = vpop.f32.mrb[9].mxu0 }
 0x697   :  { %2674 = vtanh.f32 %v509_v7  ;;  %v2154_v11 = vmul.f32 -1.442695, %v509_v7 }
 0x699   :  { %2676 = vpow2.f32 %v2154_v11 }
 0x6a1   :  { %v2675_v10 = vpop.eup %2674 }
 0x6a2   :  { %519 = vrot.lane.b32.xlu0 %v2675_v10, %s2892_s10 }
 0x6a3   :  { %v2677_v12 = vpop.eup %2676 }
 0x6a4   :  { %v513_v13 = vadd.f32 1.0, %v2677_v12 }
 0x6a6   :  { %2678 = vrcp.f32 %v513_v13 }
 0x6b0   :  { %v2679_v15 = vpop.eup %2678 }
 0x6b1   :  { %v517_v19 = vmul.f32 %v2679_v15, %v422_v50 }
 0x714   :  { %v520_v17 = vpop.permute.xlu0 %519 }
 0x715   :  { %v522_v18 = vmul.f32 %v2679_v15, %v520_v17  ;;  %v1074_v17 = vld [vmem:[#allocation7 + $0x20] sm:$0xff] }
 0x717   :  { %524 = vrot.lane.b32.xlu1 %v522_v18, %s2893_s11  ;;  %v1075_v18 = vld [vmem:[#allocation7 + $0x28] sm:$0xff] }
 0x789   :  { %v525_v20 = vpop.permute.xlu1 %524 }
 0x78a   :  { %v527_v21 = vadd.f32 %v525_v20, %v517_v19  ;;  %v2585_v19 = vpack.c.bf16 %v1075_v18, %v1074_v17 }
 0x78c   :  { %2680 = vtanh.f32 %v527_v21 }
 0x796   :  { %v2681_v22 = vpop.eup %2680 }
 0x797   :  { %530 = vrot.lane.b32.xlu0 %v2681_v22, %s2892_s10 }
 0x809   :  { %v531_v23 = vpop.permute.xlu0 %530 }
 0x80a   :  { %v533_v24 = vmul.f32 %v2679_v15, %v531_v23  ;;  %v1076_v23 = vld [vmem:[#allocation7 + $0x30] sm:$0xff] }
 0x80c   :  { %535 = vrot.lane.b32.xlu1 %v533_v24, %s2893_s11  ;;  %v1077_v24 = vld [vmem:[#allocation7 + $0x38] sm:$0xff] }
 0x87e   :  { %v536_v25 = vpop.permute.xlu1 %535 }
 0x87f   :  { %539 = vst.msk [vmem:[#allocation3 + $0x10] sm:$0xff] %vm84_vm1, %v536_v25  ;;  %2364 = vmatmul.mubr.msk.f32.vlgmr.msra.gmra.mrb[4].mxu1 %vm84_vm1, %v536_v25  ;;  %v2589_v25 = vpack.c.bf16 %v1077_v24, %v1076_v23 }
 0x880   :  { %2569 = vmatpush3.bf16.msra.mxu1 %v2985_v9  ;;  %2385 = vmatprep.mubr.msk.f32.mxu1 %vm2890_vm0, %v2891_v1 }
 0x881   :  { %2570 = vmatprep.subr.bf16.mxu1 %v2889_v0 }
 0x884   :  { %2572 = vmatpush3.bf16.msra.mxu1 %v2989_v14 }
 0x885   :  { %2579 = vmatprep.subr.bf16.mxu1 %v2889_v0 }
 0x952   :  { %v610_v27 = vpop.f32.mrb[4].mxu1 }
 0x953   :  { %v614_v28 = vadd.f32 %v610_v27, %v191_v26  ;;  %v2365_v29 = vpop.f32.mrb[5].mxu1  ;;  %v1065_v27 = vld [vmem:[#allocation3] sm:$0xff] }
 0x954   :  { %v1067_v29 = vld [vmem:[#allocation3 + $0x10] sm:$0xff] }
 0x955   :  { %2682 = vtanh.f32 %v614_v28  ;;  %v2156_v31 = vmul.f32 -1.442695, %v614_v28  ;;  %v1066_v28 = vld [vmem:[#allocation3 + $0x8] sm:$0xff] }
 0x957   :  { %2684 = vpow2.f32 %v2156_v31 }
 0x95f   :  { %v2683_v30 = vpop.eup %2682 }
 0x960   :  { %624 = vrot.lane.b32.xlu0 %v2683_v30, %s2892_s10 }
 0x961   :  { %v2685_v32 = vpop.eup %2684 }
 0x962   :  { %v618_v33 = vadd.f32 1.0, %v2685_v32 }
 0x964   :  { %2686 = vrcp.f32 %v618_v33  ;;  %v206_v33 = vadd.f32 %v3010_v16, %v3044_v3 }
 0x96e   :  { %v2687_v34 = vpop.eup %2686 }
 0x96f   :  { %v622_v37 = vmul.f32 %v2687_v34, %v527_v21 }
 0x9d2   :  { %v625_v35 = vpop.permute.xlu0 %624 }
 0x9d3   :  { %v627_v36 = vmul.f32 %v2687_v34, %v625_v35 }
 0x9d5   :  { %629 = vrot.lane.b32.xlu1 %v627_v36, %s2893_s11 }
 0xa47   :  { %v630_v38 = vpop.permute.xlu1 %629 }
 0xa48   :  { %v632_v39 = vadd.f32 %v630_v38, %v622_v37 }
 0xa4a   :  { %2688 = vtanh.f32 %v632_v39 }
 0xa54   :  { %v2689_v40 = vpop.eup %2688 }
 0xa55   :  { %635 = vrot.lane.b32.xlu0 %v2689_v40, %s2892_s10 }
 0xac7   :  { %v636_v41 = vpop.permute.xlu0 %635 }
 0xac8   :  { %v638_v42 = vmul.f32 %v2687_v34, %v636_v41 }
 0xaca   :  { %640 = vrot.lane.b32.xlu1 %v638_v42, %s2893_s11 }
 0xb3c   :  { %v641_v43 = vpop.permute.xlu1 %640 }
 0xb3d   :  { %644 = vst.msk [vmem:[#allocation3 + $0x18] sm:$0xff] %vm84_vm1, %v641_v43  ;;  %2375 = vmatmul.mubr.msk.f32.vlgmr.msra.gmra.mrb[10].mxu0 %vm84_vm1, %v641_v43 }
 0xb3e   :  { %2575 = vmatpush3.bf16.msra.mxu0 %v2985_v9  ;;  %2396 = vmatprep.mubr.msk.f32.mxu0 %vm2890_vm0, %v2891_v1 }
 0xb3f   :  { %2576 = vmatprep.subr.bf16.mxu0 %v2889_v0 }
 0xb42   :  { %2578 = vmatpush3.bf16.msra.mxu0 %v2989_v14 }
 0xb43   :  { %2586 = vmatprep.subr.bf16.mxu0 %v2585_v19 }
 0xb44   :  { %v1068_v30 = vld [vmem:[#allocation3 + $0x18] sm:$0xff] }
 0xc10   :  { %v715_v45 = vpop.f32.mrb[10].mxu0 }
 0xc11   :  { %v719_v46 = vadd.f32 %v715_v45, %v196_v44  ;;  %v2376_v47 = vpop.f32.mrb[11].mxu0 }
 0xc13   :  { %2690 = vtanh.f32 %v719_v46  ;;  %v2158_v49 = vmul.f32 -1.442695, %v719_v46 }
 0xc15   :  { %2692 = vpow2.f32 %v2158_v49 }
 0xc1d   :  { %v2691_v48 = vpop.eup %2690 }
 0xc1e   :  { %729 = vrot.lane.b32.xlu0 %v2691_v48, %s2892_s10 }
 0xc1f   :  { %v2693_v50 = vpop.eup %2692 }
 0xc20   :  { %v723_v51 = vadd.f32 1.0, %v2693_v50 }
 0xc22   :  { %2694 = vrcp.f32 %v723_v51 }
 0xc2c   :  { %v2695_v52 = vpop.eup %2694 }
 0xc2d   :  { %v727_v55 = vmul.f32 %v2695_v52, %v632_v39 }
 0xc90   :  { %v730_v53 = vpop.permute.xlu0 %729 }
 0xc91   :  { %v732_v54 = vmul.f32 %v2695_v52, %v730_v53  ;;  %v1224_v53 = vld [vmem:[#allocation9 + $0x20] sm:$0xff] }
 0xc93   :  { %734 = vrot.lane.b32.xlu1 %v732_v54, %s2893_s11  ;;  %v1225_v54 = vld [vmem:[#allocation9 + $0x28] sm:$0xff] }
 0xd05   :  { %v735_v56 = vpop.permute.xlu1 %734 }
 0xd06   :  { %v737_v57 = vadd.f32 %v735_v56, %v727_v55  ;;  %v3126_v55 = vpack.c.bf16 %v1225_v54, %v1224_v53  ;;  %v1226_v56 = vld [vmem:[#allocation9 + $0x30] sm:$0xff] }
 0xd08   :  { %2696 = vtanh.f32 %v737_v57 }
 0xd12   :  { %v2697_v58 = vpop.eup %2696 }
 0xd13   :  { %740 = vrot.lane.b32.xlu0 %v2697_v58, %s2892_s10 }
 0xd85   :  { %v741_v59 = vpop.permute.xlu0 %740 }
 0xd86   :  { %v743_v60 = vmul.f32 %v2695_v52, %v741_v59 }
 0xd88   :  { %745 = vrot.lane.b32.xlu1 %v743_v60, %s2893_s11 }
 0xdfa   :  { %v746_v61 = vpop.permute.xlu1 %745 }
 0xdfb   :  { %749 = vst.msk [vmem:[#allocation3 + $0x20] sm:$0xff] %vm84_vm1, %v746_v61  ;;  %2386 = vmatmul.mubr.msk.f32.vlgmr.msra.gmra.mrb[6].mxu1 %vm84_vm1, %v746_v61 }
 0xdfc   :  { %2581 = vmatpush3.bf16.msra.mxu1 %v2985_v9  ;;  %2407 = vmatprep.mubr.msk.f32.mxu1 %vm2890_vm0, %v2891_v1 }
 0xdfd   :  { %2582 = vmatprep.subr.bf16.mxu1 %v2889_v0 }
 0xe00   :  { %2584 = vmatpush3.bf16.msra.mxu1 %v2989_v14 }
 0xe01   :  { %2593 = vmatprep.subr.bf16.mxu1 %v2889_v0 }
 0xe02   :  { %v1069_v31 = vld [vmem:[#allocation3 + $0x20] sm:$0xff] }
 0xece   :  { %v820_v4 = vpop.f32.mrb[6].mxu1 }
 0xecf   :  { %v824_v5 = vadd.f32 %v820_v4, %v201_v63  ;;  %v2387_v6 = vpop.f32.mrb[7].mxu1  ;;  %v211_v4 = vadd.f32 %v3042_v2, %v3010_v16 }
 0xed1   :  { %2698 = vtanh.f32 %v824_v5  ;;  %v2160_v9 = vmul.f32 -1.442695, %v824_v5 }
 0xed3   :  { %2700 = vpow2.f32 %v2160_v9  ;;  %v3156_v9 = vld [vmem:[%s3288_s3 + $0x1] ss:$0 sm:$0xff] }
 0xedb   :  { %v2699_v7 = vpop.eup %2698 }
 0xedc   :  { %834 = vrot.lane.b32.xlu0 %v2699_v7, %s2892_s10 }
 0xedd   :  { %v2701_v8 = vpop.eup %2700 }
 0xede   :  { %v828_v10 = vadd.f32 1.0, %v2701_v8 }
 0xee0   :  { %2702 = vrcp.f32 %v828_v10 }
 0xeea   :  { %v2703_v11 = vpop.eup %2702 }
 0xeeb   :  { %v832_v13 = vmul.f32 %v2703_v11, %v737_v57  ;;  %v1227_v57 = vld [vmem:[#allocation9 + $0x38] sm:$0xff] }
 0xeec   :  { %v3130_v58 = vpack.c.bf16 %v1227_v57, %v1226_v56 }
 0xf4e   :  { %v835_v12 = vpop.permute.xlu0 %834 }
 0xf4f   :  { %v837_v14 = vmul.f32 %v2703_v11, %v835_v12 }
 0xf51   :  { %839 = vrot.lane.b32.xlu1 %v837_v14, %s2893_s11 }
 0xfc3   :  { %v840_v15 = vpop.permute.xlu1 %839 }
 0xfc4   :  { %v842_v62 = vadd.f32 %v840_v15, %v832_v13 }
 0xfc6   :  { %2704 = vtanh.f32 %v842_v62 }
 0xfd0   :  { %v2705_v20 = vpop.eup %2704 }
 0xfd1   :  { %845 = vrot.lane.b32.xlu0 %v2705_v20, %s2892_s10 }
0x1043   :  { %v846_v21 = vpop.permute.xlu0 %845 }
0x1044   :  { %v848_v22 = vmul.f32 %v2703_v11, %v846_v21 }
0x1046   :  { %850 = vrot.lane.b32.xlu1 %v848_v22, %s2893_s11 }
0x10b8   :  { %v851_v26 = vpop.permute.xlu1 %850 }
0x10b9   :  { %854 = vst.msk [vmem:[#allocation3 + $0x28] sm:$0xff] %vm84_vm1, %v851_v26  ;;  %2397 = vmatmul.mubr.msk.f32.vlgmr.msra.gmra.mrb[12].mxu0 %vm84_vm1, %v851_v26 }
0x10ba   :  { %2588 = vmatpush3.bf16.msra.mxu0 %v2585_v19  ;;  %2418 = vmatprep.mubr.msk.f32.mxu0 %vm84_vm1, %v1065_v27 }
0x10bb   :  { %2590 = vmatprep.subr.bf16.mxu0 %v2589_v25 }
0x10be   :  { %2592 = vmatpush3.bf16.msra.mxu0 %v2589_v25 }
0x10bf   :  { %2605 = vmatprep.subr.bf16.mxu0 %v2889_v0 }
0x10c0   :  { %v1070_v32 = vld [vmem:[#allocation3 + $0x28] sm:$0xff] }
0x10c1   :  { %2419 = vmatmul.mubr.msk.f32.vlgmr.msra.gmra.mrb[14].mxu0 %vm84_vm1, %v1066_v28 }
0x10c2   :  { %2421 = vmatprep.mubr.msk.f32.mxu0 %vm84_vm1, %v1067_v29  ;;  %2607 = vmatpush3.bf16.msra.mxu0 %v3126_v55 }
0x10c3   :  { %2608 = vmatprep.subr.bf16.mxu0 %v2889_v0 }
0x10c5   :  { %2422 = vmatmul.mubr.msk.f32.gmra.mrb[16].mxu0 %vm84_vm1, %v1068_v30 }
0x10c6   :  { %2424 = vmatprep.mubr.msk.f32.mxu0 %vm84_vm1, %v1069_v31  ;;  %2610 = vmatpush3.bf16.msra.mxu0 %v3130_v58 }
0x10c7   :  { %2617 = vmatprep.subr.bf16.mxu0 %v2889_v0 }
0x10c9   :  { %2425 = vmatmul.mubr.msk.f32.gmra.mrb[18].mxu0 %vm84_vm1, %v1070_v32 }
0x118c   :  { %v925_v34 = vpop.f32.mrb[12].mxu0 }
0x118d   :  { %v929_v35 = vadd.f32 %v925_v34, %v206_v33  ;;  %v2398_v36 = vpop.f32.mrb[13].mxu0 }
0x118f   :  { %2706 = vtanh.f32 %v929_v35  ;;  %v2162_v44 = vmul.f32 -1.442695, %v929_v35 }
0x1191   :  { %2708 = vpow2.f32 %v2162_v44 }
0x1194   :  { %v3110_v37 = vpop.f32.mrb[14].mxu0 }
0x1195   :  { %v1176_v38 = vpop.f32.mrb[15].mxu0 }
0x1196   :  { %v1177_v8 = vadd.f32 %v3156_v9, %v1176_v38 }
0x1198   :  { %v3112_v39 = vpop.f32.mrb[16].mxu0 }
0x1199   :  { %v2707_v40 = vpop.eup %2706  ;;  %v3114_v41 = vpop.f32.mrb[17].mxu0 }
0x119a   :  { %939 = vrot.lane.b32.xlu0 %v2707_v40, %s2892_s10  ;;  %v1182_v40 = vadd.f32 %v3110_v37, %v3156_v9 }
0x119b   :  { %v2709_v3 = vpop.eup %2708 }
0x119c   :  { %v3117_v42 = vpop.f32.mrb[18].mxu0  ;;  %v933_v45 = vadd.f32 1.0, %v2709_v3 }
0x119d   :  { %v3119_v43 = vpop.f32.mrb[19].mxu0 }
0x119e   :  { %2710 = vrcp.f32 %v933_v45 }
0x11a8   :  { %v2711_v46 = vpop.eup %2710 }
0x11a9   :  { %v937_v49 = vmul.f32 %v2711_v46, %v842_v62 }
0x120c   :  { %v940_v47 = vpop.permute.xlu0 %939 }
0x120d   :  { %v942_v48 = vmul.f32 %v2711_v46, %v940_v47 }
0x120f   :  { %944 = vrot.lane.b32.xlu1 %v942_v48, %s2893_s11 }
0x1281   :  { %v945_v50 = vpop.permute.xlu1 %944 }
0x1282   :  { %v3122_v51 = vadd.f32 %v945_v50, %v937_v49 }
0x1284   :  { %2712 = vtanh.f32 %v3122_v51 }
0x128e   :  { %v2713_v52 = vpop.eup %2712 }
0x128f   :  { %950 = vrot.lane.b32.xlu0 %v2713_v52, %s2892_s10 }
0x1301   :  { %v951_v59 = vpop.permute.xlu0 %950 }
0x1302   :  { %v953_v60 = vmul.f32 %v2711_v46, %v951_v59 }
0x1304   :  { %955 = vrot.lane.b32.xlu1 %v953_v60, %s2893_s11 }
0x1376   :  { %v956_v61 = vpop.permute.xlu1 %955 }
0x1377   :  { %959 = vst.msk [vmem:[#allocation3 + $0x30] sm:$0xff] %vm84_vm1, %v956_v61  ;;  %2408 = vmatmul.mubr.msk.f32.vlgmr.msra.gmra.mrb[8].mxu1 %vm84_vm1, %v956_v61 }
0x1378   :  { %2595 = vmatpush3.bf16.msra.mxu1 %v3126_v55  ;;  %2438 = vmatprep.mubr.msk.f32.mxu1 %vm2890_vm0, %v2891_v1 }
0x1379   :  { %2596 = vmatprep.subr.bf16.mxu1 %v2889_v0 }
0x137c   :  { %2598 = vmatpush3.bf16.msra.mxu1 %v3130_v58 }
0x137d   :  { %2599 = vmatprep.subr.bf16.mxu1 %v2889_v0 }
0x137e   :  { %v1071_v63 = vld [vmem:[#allocation3 + $0x30] sm:$0xff] }
0x137f   :  { %2439 = vmatmul.mubr.f32.vlgmr.msra.gmra.mrb[10].mxu1 %v2891_v1  ;;  %2427 = vmatprep.mubr.msk.f32.mxu0 %vm84_vm1, %v1071_v63 }
0x1380   :  { %2601 = vmatpush3.bf16.msra.mxu1 %v3126_v55  ;;  %2449 = vmatprep.mubr.msk.f32.mxu1 %vm2890_vm0, %v2891_v1 }
0x1381   :  { %2602 = vmatprep.subr.bf16.mxu1 %v2889_v0 }
0x1384   :  { %2604 = vmatpush3.bf16.msra.mxu1 %v3130_v58 }
0x1385   :  { %2611 = vmatprep.subr.bf16.mxu1 %v2889_v0 }
0x144a   :  { %v1030_v5 = vpop.f32.mrb[8].mxu1 }
0x144b   :  { %v1034_v6 = vadd.f32 %v1030_v5, %v211_v4  ;;  %v2409_v7 = vpop.f32.mrb[9].mxu1 }
0x144d   :  { %v2164_v23 = vmul.f32 -1.442695, %v1034_v6 }
0x1452   :  { %v1295_v10 = vpop.f32.mrb[10].mxu1 }
0x1453   :  { %v1299_v11 = vadd.f32 %v1295_v10, %v1177_v8  ;;  %v2440_v12 = vpop.f32.mrb[11].mxu1 }
0x1455   :  { %2714 = vtanh.f32 %v1299_v11  ;;  %v2175_v13 = vmul.f32 -1.442695, %v1299_v11 }
0x1457   :  { %2716 = vpow2.f32 %v2175_v13 }
0x145f   :  { %v2715_v14 = vpop.eup %2714 }
0x1460   :  { %1309 = vrot.lane.b32.xlu0 %v2715_v14, %s2892_s10 }
0x1461   :  { %v2717_v16 = vpop.eup %2716 }
0x1462   :  { %v1303_v2 = vadd.f32 1.0, %v2717_v16 }
0x1464   :  { %2718 = vrcp.f32 %v1303_v2 }
0x146e   :  { %v2719_v15 = vpop.eup %2718 }
0x146f   :  { %v1307_v18 = vmul.f32 0.0, %v2719_v15 }
0x14d2   :  { %v1310_v62 = vpop.permute.xlu0 %1309 }
0x14d3   :  { %v1312_v17 = vmul.f32 %v2719_v15, %v1310_v62 }
0x14d5   :  { %1314 = vrot.lane.b32.xlu1 %v1312_v17, %s2893_s11 }
0x1547   :  { %v1315_v19 = vpop.permute.xlu1 %1314 }
0x1548   :  { %v1317_v20 = vadd.f32 %v1315_v19, %v1307_v18 }
0x154a   :  { %2720 = vtanh.f32 %v1317_v20 }
0x154b   :  { %2722 = vtanh.f32 %v1034_v6  ;;  %v1187_v6 = vadd.f32 %v3156_v9, %v3114_v41 }
0x154c   :  { %2724 = vpow2.f32 %v2164_v23 }
0x1554   :  { %v2721_v21 = vpop.eup %2720 }
0x1555   :  { %1320 = vrot.lane.b32.xlu0 %v2721_v21, %s2892_s10  ;;  %v2723_v22 = vpop.eup %2722 }
0x1556   :  { %v2725_v24 = vpop.eup %2724 }
0x1557   :  { %v1038_v25 = vadd.f32 1.0, %v2725_v24 }
0x1559   :  { %1044 = vrot.lane.b32.xlu0 %v2723_v22, %s2892_s10  ;;  %2726 = vrcp.f32 %v1038_v25  ;;  %v1192_v22 = vadd.f32 %v3112_v39, %v3156_v9 }
0x1563   :  { %v2727_v28 = vpop.eup %2726 }
0x1564   :  { %v1042_v32 = vmul.f32 %v2727_v28, %v3122_v51 }
0x15c7   :  { %v1321_v26 = vpop.permute.xlu0 %1320 }
0x15c8   :  { %v1323_v27 = vmul.f32 %v2719_v15, %v1321_v26 }
0x15ca   :  { %1326 = vrot.lane.b32.xlu1 %v1323_v27, %s2893_s11 }
0x15cb   :  { %v1045_v29 = vpop.permute.xlu0 %1044 }
0x15cc   :  { %v1047_v30 = vmul.f32 %v2727_v28, %v1045_v29 }
0x15ce   :  { %1049 = vrot.lane.b32.xlu0 %v1047_v30, %s2893_s11 }
0x163c   :  { %v1327_v31 = vpop.permute.xlu1 %1326 }
0x163d   :  { %2450 = vmatmul.mubr.msk.f32.vlgmr.msra.gmra.mrb[12].mxu1 %vm84_vm1, %v1327_v31 }
0x163e   :  { %2613 = vmatpush3.bf16.msra.mxu1 %v3126_v55  ;;  %2471 = vmatprep.mubr.msk.f32.mxu1 %vm2890_vm0, %v2891_v1 }
0x163f   :  { %2614 = vmatprep.subr.bf16.mxu1 %v2889_v0 }
0x1640   :  { %v1050_v33 = vpop.permute.xlu0 %1049 }
0x1641   :  { %v1052_v34 = vadd.f32 %v1050_v33, %v1042_v32 }
0x1642   :  { %2616 = vmatpush3.bf16.msra.mxu1 %v3130_v58 }
0x1643   :  { %2728 = vtanh.f32 %v1052_v34  ;;  %2623 = vmatprep.subr.bf16.mxu1 %v2889_v0 }
0x164d   :  { %v2729_v35 = vpop.eup %2728 }
0x164e   :  { %1055 = vrot.lane.b32.xlu0 %v2729_v35, %s2892_s10 }
0x16c0   :  { %v1056_v36 = vpop.permute.xlu0 %1055 }
0x16c1   :  { %v1058_v38 = vmul.f32 %v2727_v28, %v1056_v36 }
0x16c3   :  { %1060 = vrot.lane.b32.xlu0 %v1058_v38, %s2893_s11 }
0x1710   :  { %v1396_v44 = vpop.f32.mrb[12].mxu1 }
0x1711   :  { %v1400_v3 = vadd.f32 %v1396_v44, %v1182_v40  ;;  %v2451_v45 = vpop.f32.mrb[13].mxu1  ;;  %v1197_v44 = vadd.f32 %v3156_v9, %v3119_v43 }
0x1713   :  { %2730 = vtanh.f32 %v1400_v3  ;;  %v2177_v49 = vmul.f32 -1.442695, %v1400_v3 }
0x1715   :  { %2732 = vpow2.f32 %v2177_v49 }
0x171d   :  { %v2731_v46 = vpop.eup %2730 }
0x171e   :  { %1410 = vrot.lane.b32.xlu1 %v2731_v46, %s2892_s10 }
0x171f   :  { %v2733_v50 = vpop.eup %2732 }
0x1720   :  { %v1404_v37 = vadd.f32 1.0, %v2733_v50 }
0x1722   :  { %2734 = vrcp.f32 %v1404_v37 }
0x172c   :  { %v2735_v51 = vpop.eup %2734 }
0x172d   :  { %v1408_v54 = vmul.f32 %v2735_v51, %v1317_v20 }
0x1735   :  { %v1061_v47 = vpop.permute.xlu0 %1060 }
0x1736   :  { %1064 = vst.msk [vmem:[#allocation3 + $0x38] sm:$0xff] %vm84_vm1, %v1061_v47 }
0x173d   :  { %v1072_v48 = vld [vmem:[#allocation3 + $0x38] sm:$0xff] }
0x173e   :  { %2428 = vmatmul.mubr.msk.f32.gmra.mrb[20].mxu0 %vm84_vm1, %v1072_v48 }
0x173f   :  { %2460 = vmatprep.mubr.msk.f32.mxu0 %vm2890_vm0, %v2891_v1 }
0x1790   :  { %v1411_v52 = vpop.permute.xlu1 %1410 }
0x1791   :  { %v1413_v53 = vmul.f32 %v2735_v51, %v1411_v52 }
0x1793   :  { %1415 = vrot.lane.b32.xlu1 %v1413_v53, %s2893_s11 }
0x1805   :  { %v1416_v56 = vpop.permute.xlu1 %1415 }
0x1806   :  { %v1418_v57 = vadd.f32 %v1416_v56, %v1408_v54 }
0x1808   :  { %2736 = vtanh.f32 %v1418_v57 }
0x1811   :  { %v3183_v59 = vpop.f32.mrb[20].mxu0 }
0x1812   :  { %v2737_v60 = vpop.eup %2736  ;;  %v3185_v61 = vpop.f32.mrb[21].mxu0 }
0x1813   :  { %1421 = vrot.lane.b32.xlu1 %v2737_v60, %s2892_s10 }
0x1885   :  { %v1422_v63 = vpop.permute.xlu1 %1421 }
0x1886   :  { %v1424_v4 = vmul.f32 %v2735_v51, %v1422_v63 }
0x1888   :  { %1427 = vrot.lane.b32.xlu1 %v1424_v4, %s2893_s11  ;;  %v1202_v4 = vadd.f32 %v3117_v42, %v3156_v9 }
0x18fa   :  { %v1428_v5 = vpop.permute.xlu1 %1427 }
0x18fb   :  { %2461 = vmatmul.mubr.msk.f32.vlgmr.msra.gmra.mrb[22].mxu0 %vm84_vm1, %v1428_v5 }
0x18fc   :  { %2619 = vmatpush3.bf16.msra.mxu0 %v3126_v55  ;;  %2482 = vmatprep.mubr.msk.f32.mxu0 %vm2890_vm0, %v2891_v1 }
0x18fd   :  { %2620 = vmatprep.subr.bf16.mxu0 %v2889_v0 }
0x1900   :  { %2622 = vmatpush3.bf16.msra.mxu0 %v3130_v58 }
0x1901   :  { %2629 = vmatprep.subr.bf16.mxu0 %v2889_v0 }
0x19ce   :  { %v1497_v7 = vpop.f32.mrb[22].mxu0 }
0x19cf   :  { %v1501_v8 = vadd.f32 %v1497_v7, %v1187_v6  ;;  %v2462_v10 = vpop.f32.mrb[23].mxu0 }
0x19d1   :  { %2738 = vtanh.f32 %v1501_v8  ;;  %v2179_v12 = vmul.f32 -1.442695, %v1501_v8 }
0x19d3   :  { %2740 = vpow2.f32 %v2179_v12 }
0x19db   :  { %v2739_v11 = vpop.eup %2738 }
0x19dc   :  { %1511 = vrot.lane.b32.xlu0 %v2739_v11, %s2892_s10 }
0x19dd   :  { %v2741_v14 = vpop.eup %2740 }
0x19de   :  { %v1505_v13 = vadd.f32 1.0, %v2741_v14 }
0x19e0   :  { %2742 = vrcp.f32 %v1505_v13 }
0x19ea   :  { %v2743_v16 = vpop.eup %2742 }
0x19eb   :  { %v1509_v62 = vmul.f32 %v2743_v16, %v1418_v57 }
0x1a4e   :  { %v1512_v2 = vpop.permute.xlu0 %1511 }
0x1a4f   :  { %v1514_v15 = vmul.f32 %v2743_v16, %v1512_v2 }
0x1a51   :  { %1516 = vrot.lane.b32.xlu1 %v1514_v15, %s2893_s11 }
0x1ac3   :  { %v1517_v17 = vpop.permute.xlu1 %1516 }
0x1ac4   :  { %v1519_v41 = vadd.f32 %v1517_v17, %v1509_v62 }
0x1ac6   :  { %2744 = vtanh.f32 %v1519_v41 }
0x1ad0   :  { %v2745_v18 = vpop.eup %2744 }
0x1ad1   :  { %1522 = vrot.lane.b32.xlu0 %v2745_v18, %s2892_s10 }
0x1b43   :  { %v1523_v19 = vpop.permute.xlu0 %1522 }
0x1b44   :  { %v1525_v20 = vmul.f32 %v2743_v16, %v1523_v19 }
0x1b46   :  { %1528 = vrot.lane.b32.xlu1 %v1525_v20, %s2893_s11 }
0x1bb8   :  { %v1529_v21 = vpop.permute.xlu1 %1528 }
0x1bb9   :  { %2472 = vmatmul.mubr.msk.f32.vlgmr.msra.gmra.mrb[14].mxu1 %vm84_vm1, %v1529_v21 }
0x1bba   :  { %2625 = vmatpush3.bf16.msra.mxu1 %v3126_v55  ;;  %2493 = vmatprep.mubr.msk.f32.mxu1 %vm2890_vm0, %v2891_v1 }
0x1bbb   :  { %2626 = vmatprep.subr.bf16.mxu1 %v2889_v0 }
0x1bbe   :  { %2628 = vmatpush3.bf16.msra.mxu1 %v3130_v58 }
0x1bbf   :  { %2635 = vmatprep.subr.bf16.mxu1 %v2889_v0 }
0x1c8c   :  { %v1598_v23 = vpop.f32.mrb[14].mxu1 }
0x1c8d   :  { %v1602_v24 = vadd.f32 %v1598_v23, %v1192_v22  ;;  %v2473_v25 = vpop.f32.mrb[15].mxu1 }
0x1c8f   :  { %2746 = vtanh.f32 %v1602_v24  ;;  %v2181_v27 = vmul.f32 -1.442695, %v1602_v24 }
0x1c91   :  { %2748 = vpow2.f32 %v2181_v27 }
0x1c99   :  { %v2747_v26 = vpop.eup %2746 }
0x1c9a   :  { %1612 = vrot.lane.b32.xlu0 %v2747_v26, %s2892_s10 }
0x1c9b   :  { %v2749_v28 = vpop.eup %2748 }
0x1c9c   :  { %v1606_v29 = vadd.f32 1.0, %v2749_v28 }
0x1c9e   :  { %2750 = vrcp.f32 %v1606_v29 }
0x1ca8   :  { %v2751_v30 = vpop.eup %2750 }
0x1ca9   :  { %v1610_v33 = vmul.f32 %v2751_v30, %v1519_v41  ;;  %v1207_v41 = vadd.f32 %v3156_v9, %v3185_v61 }
0x1d0c   :  { %v1613_v31 = vpop.permute.xlu0 %1612 }
0x1d0d   :  { %v1615_v32 = vmul.f32 %v2751_v30, %v1613_v31 }
0x1d0f   :  { %1617 = vrot.lane.b32.xlu1 %v1615_v32, %s2893_s11 }
0x1d81   :  { %v1618_v34 = vpop.permute.xlu1 %1617 }
0x1d82   :  { %v1620_v39 = vadd.f32 %v1618_v34, %v1610_v33  ;;  %v1212_v33 = vadd.f32 %v3183_v59, %v3156_v9  ;;  %v2031_v59 = vld [vmem:[%s3289_s4] sm:$0xff] }
0x1d84   :  { %2752 = vtanh.f32 %v1620_v39 }
0x1d8e   :  { %v2753_v35 = vpop.eup %2752 }
0x1d8f   :  { %1623 = vrot.lane.b32.xlu0 %v2753_v35, %s2892_s10 }
0x1e01   :  { %v1624_v36 = vpop.permute.xlu0 %1623 }
0x1e02   :  { %v1626_v38 = vmul.f32 %v2751_v30, %v1624_v36 }
0x1e04   :  { %1629 = vrot.lane.b32.xlu1 %v1626_v38, %s2893_s11 }
0x1e76   :  { %v1630_v40 = vpop.permute.xlu1 %1629 }
0x1e77   :  { %2483 = vmatmul.mubr.msk.f32.vlgmr.msra.gmra.mrb[24].mxu0 %vm84_vm1, %v1630_v40 }
0x1e78   :  { %2631 = vmatpush3.bf16.msra.mxu0 %v3126_v55  ;;  %2504 = vmatprep.mubr.msk.f32.mxu0 %vm2890_vm0, %v2891_v1 }
0x1e79   :  { %2632 = vmatprep.subr.bf16.mxu0 %v2889_v0 }
0x1e7c   :  { %2634 = vmatpush3.bf16.msra.mxu0 %v3130_v58 }
0x1e7d   :  { %2641 = vmatprep.subr.bf16.mxu0 %v2889_v0 }
0x1f4a   :  { %v1699_v3 = vpop.f32.mrb[24].mxu0 }
0x1f4b   :  { %v1703_v45 = vadd.f32 %v1699_v3, %v1197_v44  ;;  %v2484_v46 = vpop.f32.mrb[25].mxu0 }
0x1f4d   :  { %2754 = vtanh.f32 %v1703_v45  ;;  %v2183_v48 = vmul.f32 -1.442695, %v1703_v45 }
0x1f4f   :  { %2756 = vpow2.f32 %v2183_v48 }
0x1f57   :  { %v2755_v47 = vpop.eup %2754 }
0x1f58   :  { %1713 = vrot.lane.b32.xlu0 %v2755_v47, %s2892_s10 }
0x1f59   :  { %v2757_v49 = vpop.eup %2756 }
0x1f5a   :  { %v1707_v50 = vadd.f32 1.0, %v2757_v49  ;;  %v2032_v49 = vld [vmem:[%s3289_s4 + $0x8] sm:$0xff] }
0x1f5c   :  { %2758 = vrcp.f32 %v1707_v50  ;;  %v2033_v50 = vld [vmem:[%s3289_s4 + $0x10] sm:$0xff] }
0x1f66   :  { %v2759_v37 = vpop.eup %2758 }
0x1f67   :  { %v1711_v53 = vmul.f32 %v2759_v37, %v1620_v39 }
0x1fca   :  { %v1714_v51 = vpop.permute.xlu0 %1713 }
0x1fcb   :  { %v1716_v52 = vmul.f32 %v2759_v37, %v1714_v51  ;;  %v2034_v51 = vld [vmem:[%s3289_s4 + $0x18] sm:$0xff]  ;;  %s2894_s4 = smov [#allocation10]  }
0x1fcc   :  { %s2131_s22 = sshll.u32 %s2894_s4, 4  ;;  %s2132_s22 = int_to_ptr.vmem [resolvable:$true] %s2131_s22 }
0x1fcd   :  { %1718 = vrot.lane.b32.xlu1 %v1716_v52, %s2893_s11  ;;  %v2645_v52 = vpack.c.bf16 %v2034_v51, %v2033_v50  ;;  %s2856_s23 = scalar_lea.vmem %s2132_s22, 128  ;;  %p2861_p11 = scmp.lt.s32.totalorder %s2132_s22, %s2132_s22 }
0x1fce   :  { %p2857_p10 = scmp.ne.s32.totalorder %s2132_s22, %s2856_s23  ;;  %p2862_p12 = scmp.lt.s32.totalorder %s2856_s23, %s2856_s23 }
0x1fd0   :  { %p2863_p13 = por %p2862_p12, %p2861_p11 }
0x1fd2   :  { %p2864_p0 = pnand %p2863_p13, %p2857_p10 }
0x203f   :  { %v1719_v54 = vpop.permute.xlu1 %1718 }
0x2040   :  { %v1721_v43 = vadd.f32 %v1719_v54, %v1711_v53 }
0x2042   :  { %2760 = vtanh.f32 %v1721_v43 }
0x204c   :  { %v2761_v56 = vpop.eup %2760 }
0x204d   :  { %1724 = vrot.lane.b32.xlu0 %v2761_v56, %s2892_s10 }
0x20bf   :  { %v1725_v57 = vpop.permute.xlu0 %1724 }
0x20c0   :  { %v1727_v60 = vmul.f32 %v2759_v37, %v1725_v57  ;;  %v2642_v37 = vpack.c.bf16 %v2032_v49, %v2031_v59  ;;  %v2190_v57 = vld [vmem:[%s3290_s5] ss:$0 sm:$0xff] }
0x20c2   :  { %1730 = vrot.lane.b32.xlu1 %v1727_v60, %s2893_s11 }
0x2134   :  { %v1731_v63 = vpop.permute.xlu1 %1730 }
0x2135   :  { %2494 = vmatmul.mubr.msk.f32.vlgmr.msra.gmra.mrb[16].mxu1 %vm84_vm1, %v1731_v63 }
0x2136   :  { %2637 = vmatpush3.bf16.msra.mxu1 %v3126_v55  ;;  %2515 = vmatprep.mubr.msk.f32.mxu1 %vm2890_vm0, %v2891_v1 }
0x2137   :  { %2638 = vmatprep.subr.bf16.mxu1 %v2889_v0 }
0x213a   :  { %2640 = vmatpush3.bf16.msra.mxu1 %v3130_v58 }
0x2208   :  { %v1800_v5 = vpop.f32.mrb[16].mxu1 }
0x2209   :  { %v1804_v6 = vadd.f32 %v1800_v5, %v1202_v4  ;;  %v2495_v7 = vpop.f32.mrb[17].mxu1 }
0x220b   :  { %2762 = vtanh.f32 %v1804_v6  ;;  %v2185_v10 = vmul.f32 -1.442695, %v1804_v6 }
0x220d   :  { %2764 = vpow2.f32 %v2185_v10 }
0x2215   :  { %v2763_v8 = vpop.eup %2762 }
0x2216   :  { %1814 = vrot.lane.b32.xlu0 %v2763_v8, %s2892_s10 }
0x2217   :  { %v2765_v55 = vpop.eup %2764 }
0x2218   :  { %v1808_v11 = vadd.f32 1.0, %v2765_v55 }
0x221a   :  { %2766 = vrcp.f32 %v1808_v11 }
0x2224   :  { %v2767_v12 = vpop.eup %2766 }
0x2225   :  { %v1812_v58 = vmul.f32 %v2767_v12, %v1721_v43 }
0x2288   :  { %v1815_v14 = vpop.permute.xlu0 %1814 }
0x2289   :  { %v1817_v13 = vmul.f32 %v2767_v12, %v1815_v14 }
0x228b   :  { %1819 = vrot.lane.b32.xlu1 %v1817_v13, %s2893_s11 }
0x22fd   :  { %v1820_v16 = vpop.permute.xlu1 %1819 }
0x22fe   :  { %v1822_v42 = vadd.f32 %v1820_v16, %v1812_v58 }
0x2300   :  { %2768 = vtanh.f32 %v1822_v42 }
0x230a   :  { %v2769_v2 = vpop.eup %2768 }
0x230b   :  { %1825 = vrot.lane.b32.xlu0 %v2769_v2, %s2892_s10 }
0x237d   :  { %v1826_v15 = vpop.permute.xlu0 %1825 }
0x237e   :  { %v1828_v62 = vmul.f32 %v2767_v12, %v1826_v15 }
0x2380   :  { %1831 = vrot.lane.b32.xlu1 %v1828_v62, %s2893_s11 }
0x23f2   :  { %v1832_v17 = vpop.permute.xlu1 %1831 }
0x23f3   :  { %2505 = vmatmul.mubr.msk.f32.vlgmr.msra.gmra.mrb[26].mxu0 %vm84_vm1, %v1832_v17 }
0x23f4   :  { %2526 = vmatprep.mubr.msk.f32.mxu0 %vm2890_vm0, %v2891_v1  ;;  %2643 = vmatpush3.bf16.msra.mxu0 %v2642_v37 }
0x23f5   :  { %2644 = vmatprep.subr.bf16.mxu0 %v2889_v0 }
0x23f8   :  { %2646 = vmatpush3.bf16.msra.mxu0 %v2645_v52 }
0x24c6   :  { %v1901_v18 = vpop.f32.mrb[26].mxu0 }
0x24c7   :  { %v1905_v19 = vadd.f32 %v1901_v18, %v1207_v41  ;;  %v2506_v20 = vpop.f32.mrb[27].mxu0 }
0x24c9   :  { %2770 = vtanh.f32 %v1905_v19  ;;  %v2187_v22 = vmul.f32 -1.442695, %v1905_v19 }
0x24cb   :  { %2772 = vpow2.f32 %v2187_v22 }
0x24d3   :  { %v2771_v21 = vpop.eup %2770 }
0x24d4   :  { %1915 = vrot.lane.b32.xlu0 %v2771_v21, %s2892_s10 }
0x24d5   :  { %v2773_v23 = vpop.eup %2772 }
0x24d6   :  { %v1909_v24 = vadd.f32 1.0, %v2773_v23 }
0x24d8   :  { %2774 = vrcp.f32 %v1909_v24 }
0x24e2   :  { %v2775_v25 = vpop.eup %2774 }
0x24e3   :  { %v1913_v1 = vmul.f32 %v2775_v25, %v1822_v42 }
0x2546   :  { %v1916_v26 = vpop.permute.xlu0 %1915 }
0x2547   :  { %v1918_v27 = vmul.f32 %v2775_v25, %v1916_v26 }
0x2549   :  { %1920 = vrot.lane.b32.xlu1 %v1918_v27, %s2893_s11 }
0x25bb   :  { %v1921_v28 = vpop.permute.xlu1 %1920 }
0x25bc   :  { %v1923_v61 = vadd.f32 %v1921_v28, %v1913_v1 }
0x25be   :  { %2776 = vtanh.f32 %v1923_v61 }
0x25c8   :  { %v2777_v29 = vpop.eup %2776 }
0x25c9   :  { %1926 = vrot.lane.b32.xlu0 %v2777_v29, %s2892_s10 }
0x263b   :  { %v1927_v30 = vpop.permute.xlu0 %1926 }
0x263c   :  { %v1929_v31 = vmul.f32 %v2775_v25, %v1927_v30 }
0x263e   :  { %1932 = vrot.lane.b32.xlu1 %v1929_v31, %s2893_s11 }
0x26b0   :  { %v1933_v32 = vpop.permute.xlu1 %1932 }
0x26b1   :  { %2516 = vmatmul.mubr.msk.f32.vlgmr.msra.gmra.mrb[18].mxu1 %vm84_vm1, %v1933_v32 }
0x2784   :  { %v2002_v34 = vpop.f32.mrb[18].mxu1 }
0x2785   :  { %v2006_v39 = vadd.f32 %v2002_v34, %v1212_v33  ;;  %v2517_v35 = vpop.f32.mrb[19].mxu1 }
0x2787   :  { %2778 = vtanh.f32 %v2006_v39  ;;  %v2189_v38 = vmul.f32 -1.442695, %v2006_v39 }
0x2789   :  { %2780 = vpow2.f32 %v2189_v38 }
0x2791   :  { %v2779_v36 = vpop.eup %2778 }
0x2792   :  { %2016 = vrot.lane.b32.xlu0 %v2779_v36, %s2892_s10 }
0x2793   :  { %v2781_v40 = vpop.eup %2780 }
0x2794   :  { %v2010_v44 = vadd.f32 1.0, %v2781_v40 }
0x2796   :  { %2782 = vrcp.f32 %v2010_v44 }
0x27a0   :  { %v2783_v3 = vpop.eup %2782 }
0x27a1   :  { %v2014_v47 = vmul.f32 %v2783_v3, %v1923_v61 }
0x2804   :  { %v2017_v45 = vpop.permute.xlu0 %2016 }
0x2805   :  { %v2019_v46 = vmul.f32 %v2783_v3, %v2017_v45 }
0x2807   :  { %2021 = vrot.lane.b32.xlu1 %v2019_v46, %s2893_s11 }
0x2879   :  { %v2022_v48 = vpop.permute.xlu1 %2021 }
0x287a   :  { %v2024_v9 = vadd.f32 %v2022_v48, %v2014_v47 }
0x287c   :  { %2784 = vtanh.f32 %v2024_v9 }
0x2886   :  { %v2785_v53 = vpop.eup %2784 }
0x2887   :  { %2027 = vrot.lane.b32.xlu0 %v2785_v53, %s2892_s10 }
0x28f9   :  { %v2028_v54 = vpop.permute.xlu0 %2027 }
0x28fa   :  { %v2030_v43 = vmul.f32 %v2783_v3, %v2028_v54 }
0x28fc   :  { %2043 = vrot.lane.b32.xlu1 %v2030_v43, %s2893_s11 }
0x296e   :  { %v2044_v56 = vpop.permute.xlu1 %2043 }
0x296f   :  { %2527 = vmatmul.mubr.msk.f32.vlgmr.msra.gmra.mrb[28].mxu0 %vm84_vm1, %v2044_v56 }
0x2a42   :  { %v2113_v60 = vpop.f32.mrb[28].mxu0 }
0x2a43   :  { %v2114_v63 = vadd.f32 %v2190_v57, %v2113_v60  ;;  %v2528_v4 = vpop.f32.mrb[29].mxu0 }
0x2a45   :  { %v2192_v5 = vmul.f32 -1.442695, %v2114_v63 }
0x2a47   :  { %2786 = vpow2.f32 %v2192_v5 }
0x2a51   :  { %v2787_v0 = vpop.eup %2786 }
0x2a52   :  { %v2120_v6 = vadd.f32 1.0, %v2787_v0 }
0x2a54   :  { %2788 = vrcp.f32 %v2120_v6 }
0x2a5e   :  { %v2789_v7 = vpop.eup %2788 }
0x2a5f   :  { %2124 = vst.msk [vmem:[#allocation10] sm:$0xff] %vm2123_vm2, %v2789_v7 }
0x2a60   :  { %2867 = shalt.err (!%p2864_p0)
}
0x2a61   :  { %s2868_s26 = scalar_lea.hbm %s3291_s6, 128 }
0x2a62   :  { %p2869_p1 = scmp.ne.s32.totalorder %s3291_s6, %s2868_s26  ;;  %p2872_p2 = scmp.lt.u32.totalorder %s2868_s26, %s3291_s6 }
0x2a64   :  { %p2874_p3 = pnand %p2872_p2, %p2869_p1 }
0x2a66   :  { %2877 = shalt.err (!%p2874_p3)
}
0x2a67   :  { %2134 = dma.vmem_to_hbm [thread:$0]  %s2132_s22, 128, %s3291_s6, [#allocation6]  }
0x2a68   :  { %2882 = dma.done.wait [#allocation6], 128  }
0x2a69   :  { %2883 = vsyncadd [#allocation6], 4294967168 }
0x2a6a   :  { %2138 = vsyncpa [#allocation5], 1 }
0x2a6b   :  { %2139 = vsyncpa [#allocation8], 1 }
0x2a6c   :  { %2140 = vsyncpa [#allocation6], 1 }

</bundles_post_ra>
